<compile_context>
chip_gen: v7x
topology: tpu7x:2x2x1
jax: 0.10.0
libtpu: 0.0.40
codegen_flags: <defaults>
</compile_context>

<pallas_src>
import functools

import jax
import jax.numpy as jnp
import numpy as np
from jax.experimental import pallas as pl
from jax.experimental.pallas import tpu as pltpu


# ----------------------- fused Pallas kernel -----------------------

def _resnext_block_kernel(*refs, stride, Ho, Wo, downsample, depthwise):
    it = iter(refs)
    x_ref = next(it)                        # (1, S*S*Ho*Wo, Cin)  bf16, plane-major rows
    w1_ref = next(it); b1_ref = next(it)    # (Cin, res) bf16, (1, res) f32
    wp_ref = bp_ref = None
    if downsample:
        wp_ref = next(it); bp_ref = next(it)
    w2_ref = next(it); b2_ref = next(it)
    w3_ref = next(it); b3_ref = next(it)
    se1_ref = next(it); se2_ref = next(it)
    o_ref = next(it)
    pad_ref = next(it)                      # VMEM scratch: (S*S, Hp, Wp, res) f32

    S = stride
    HoWo = Ho * Wo
    res_c = b1_ref.shape[-1]
    cout = b3_ref.shape[-1]
    cdt = w1_ref.dtype                      # matmul compute dtype (bf16)

    xf = x_ref[0]                           # (S*S*Ho*Wo, Cin)

    # ---- c1: 1x1 conv (BN scale folded into the weight) + shift + ReLU,
    #      computed for all S*S parity planes in one matmul ----
    f1 = jnp.dot(xf, w1_ref[...], preferred_element_type=jnp.float32) + b1_ref[...]
    f1 = jnp.maximum(f1, 0.0)               # (S*S*Ho*Wo, res)

    # ---- c2: grouped 3x3 conv, stride applied at the taps via parity planes ----
    # Scratch holds each plane of f1 with a 1-px zero halo (top/left always;
    # bottom/right only when stride == 1).  Cleared every step: a zero-once at
    # program_id==0 would break if the parallel axis is split across TensorCores.
    pad_ref[...] = jnp.zeros(pad_ref.shape, pad_ref.dtype)
    pad_ref[:, 1:1 + Ho, 1:1 + Wo, :] = f1.reshape(S * S, Ho, Wo, res_c)

    def tap(ky, kx, c0=None, c1=None):
        # Output (oy, ox), tap (ky, kx) reads input (S*oy + ky - 1, S*ox + kx - 1),
        # i.e. a contiguous (Ho, Wo) window of exactly one parity plane.
        py, px = (ky - 1) % S, (kx - 1) % S
        sy = 1 + (ky - 1 - py) // S
        sx = 1 + (kx - 1 - px) // S
        p = py * S + px
        if c0 is None:
            return pad_ref[p, sy:sy + Ho, sx:sx + Wo, :]
        return pad_ref[p, sy:sy + Ho, sx:sx + Wo, c0:c1]

    if depthwise:
        # cardinality == channels (default ResNeXt-32 config): pure VPU MACs in
        # f32 (v5e-safe); accumulator initialized with the first tap product.
        acc = tap(0, 0) * w2_ref[0]
        for t in range(1, 9):
            ky, kx = divmod(t, 3)
            acc = acc + tap(ky, kx) * w2_ref[t]
        f2 = acc.reshape(HoWo, res_c)
    else:
        # General grouped conv: per-group small matmuls, no block-diagonal zeros.
        n_g, cin_pg = w2_ref.shape[1], w2_ref.shape[2]
        outs = []
        for g in range(n_g):
            acc_g = None
            for t in range(9):
                ky, kx = divmod(t, 3)
                a = tap(ky, kx, g * cin_pg, (g + 1) * cin_pg).reshape(HoWo, cin_pg)
                prod = jnp.dot(a.astype(cdt), w2_ref[t, g],
                               preferred_element_type=jnp.float32)
                acc_g = prod if acc_g is None else acc_g + prod
            outs.append(acc_g)
        f2 = jnp.concatenate(outs, axis=-1)
    f2 = jnp.maximum(f2 + b2_ref[...], 0.0)                   # (Ho*Wo, res)

    # ---- c3: 1x1 conv + BN shift (no ReLU) ----
    f3 = jnp.dot(f2.astype(cdt), w3_ref[...],
                 preferred_element_type=jnp.float32) + b3_ref[...]

    # ---- residual path: strided 1x1 projection + BN, or identity ----
    # The stride-S projection reads exactly the (0, 0) parity plane, i.e. the
    # first Ho*Wo rows of the plane-major activation matrix: no selection needed.
    if downsample:
        resid = jnp.dot(xf[:HoWo, :], wp_ref[...],
                        preferred_element_type=jnp.float32) + bp_ref[...]
    else:
        resid = xf[:HoWo, :].astype(jnp.float32)              # Cin == Cout, stride == 1

    # ---- SE (global avg pool -> fc1/ReLU -> fc2/sigmoid -> scale)
    #      + residual add + final ReLU, all on-chip ----
    pooled = jnp.mean(f3, axis=0, keepdims=True)              # (1, Cout)
    h = jnp.maximum(jnp.dot(pooled.astype(cdt), se1_ref[...],
                            preferred_element_type=jnp.float32), 0.0)
    z = jnp.dot(h.astype(cdt), se2_ref[...], preferred_element_type=jnp.float32)
    s = 1.0 / (1.0 + jnp.exp(-z))                             # sigmoid (EUP)
    out = jnp.maximum(f3 * s + resid, 0.0)                    # (Ho*Wo, Cout)
    o_ref[0] = out.reshape(Ho, Wo, cout).astype(o_ref.dtype)


# ----------------------- weight folding / helpers -----------------------

def _fold_pointwise(cb, dtype):
    # 1x1 conv (groups=1) + BN -> (Cin, Cout) bf16 weight (scale folded), (1, Cout) f32 shift.
    w = cb['w'][:, :, 0, 0]                                   # (Cout, Cin)
    w = (jnp.transpose(w) * cb['scale']).astype(dtype)        # (Cin, Cout)
    return w, cb['shift'].astype(jnp.float32)


def _fold_grouped3x3(cb, dtype):
    # Grouped 3x3 conv + BN.  Depthwise -> (9, 1, C) f32 per-tap per-channel
    # weights (VPU path); otherwise (9, g, cin_pg, cout_pg) bf16 per-tap per-group mats.
    w = cb['w']
    cout, cin_pg, kh, kw = w.shape
    assert kh == 3 and kw == 3
    g = cb['groups']
    scale, shift = cb['scale'], cb['shift'].astype(jnp.float32)
    if cin_pg == 1 and cout == g:
        dw = jnp.transpose(w[:, 0], (1, 2, 0)).reshape(kh * kw, cout)   # (9, C)
        dw = (dw * scale).astype(jnp.float32)
        return dw[:, None, :], shift, True, g                           # (9, 1, C)
    cout_pg = cout // g
    wg = w.reshape(g, cout_pg, cin_pg, kh * kw)
    wg = jnp.transpose(wg, (3, 0, 2, 1))                                # (9, g, cin_pg, cout_pg)
    wg = wg * scale.reshape(g, cout_pg)[None, :, None, :]
    return wg.astype(dtype), shift, False, g


def _const_spec(a):
    nd = a.ndim
    return pl.BlockSpec(a.shape, lambda n, nd=nd: (0,) * nd)


# ----------------------- ResNeXtBlock forward (single pallas_call) -----------------------

def resnext_block_forward_nhwc(x_nhwc, p, *, compute_dtype=jnp.bfloat16):
    """Fused ResNeXt block, NHWC in / NHWC out."""
    N, H, W, Cin = x_nhwc.shape
    stride, downsample = p['stride'], p['downsample']
    assert H % stride == 0 and W % stride == 0, "spatial dims must be divisible by the stride"
    Ho, Wo = H // stride, W // stride
    S = stride

    w1, b1 = _fold_pointwise(p['c1'], compute_dtype)
    w2, b2, depthwise, _ = _fold_grouped3x3(p['c2'], compute_dtype)
    w3, b3 = _fold_pointwise(p['c3'], compute_dtype)
    se1 = p['se_w1'].astype(compute_dtype)
    se2 = p['se_w2'].astype(compute_dtype)
    res_c = b1.shape[-1]
    Cout = b3.shape[-1]
    if not downsample:
        assert stride == 1 and Cin == Cout, (
            "identity residual requires stride == 1 and in_channels == out_channels")

    # De-interleave the input into S*S parity planes (plane-major rows) so the
    # strided conv taps / strided projection become contiguous in-kernel reads.
    xp = x_nhwc.astype(compute_dtype)
    xp = xp.reshape(N, Ho, S, Wo, S, Cin).transpose(0, 2, 4, 1, 3, 5)
    xp = xp.reshape(N, S * S * Ho * Wo, Cin)

    operands = [xp, w1, b1]
    if downsample:
        wp, bp = _fold_pointwise(p['p'], compute_dtype)
        operands += [wp, bp]
    operands += [w2, b2, w3, b3, se1, se2]

    in_specs = [pl.BlockSpec((1, S * S * Ho * Wo, Cin), lambda n: (n, 0, 0))]
    in_specs += [_const_spec(a) for a in operands[1:]]

    pb = 1 if stride == 1 else 0            # bottom/right halo only needed at stride 1
    Hp, Wp = Ho + 1 + pb, Wo + 1 + pb

    kernel = functools.partial(
        _resnext_block_kernel, stride=stride, Ho=Ho, Wo=Wo,
        downsample=downsample, depthwise=depthwise)

    out = pl.pallas_call(
        kernel,
        out_shape=jax.ShapeDtypeStruct((N, Ho, Wo, Cout), jnp.float32),
        grid_spec=pltpu.PrefetchScalarGridSpec(
            num_scalar_prefetch=0,
            grid=(N,),
            in_specs=in_specs,
            out_specs=pl.BlockSpec((1, Ho, Wo, Cout), lambda n: (n, 0, 0, 0)),
            scratch_shapes=[pltpu.VMEM((S * S, Hp, Wp, res_c), jnp.float32)]),
        compiler_params=pltpu.CompilerParams(
            dimension_semantics=("parallel",),
            vmem_limit_bytes=32 * 1024 * 1024),
    )(*operands)
    return out


def resnext_block_forward(x_nchw, p, **kw):
    # NCHW interface matching the PyTorch module; prefer the NHWC entry point if
    # the caller can supply NHWC (saves two XLA transpose passes over HBM).
    x = jnp.transpose(x_nchw, (0, 2, 3, 1))
    out = resnext_block_forward_nhwc(x, p, **kw)
    return jnp.transpose(out, (0, 3, 1, 2))


# ----------------------- Parameter construction -----------------------

def _bn_fold(key, c, eps=1e-5):
    k1, k2, k3, k4 = jax.random.split(key, 4)
    gamma = 1.0 + 0.1 * jax.random.normal(k1, (c,), jnp.float32)
    beta = 0.1 * jax.random.normal(k2, (c,), jnp.float32)
    mean = 0.1 * jax.random.normal(k3, (c,), jnp.float32)
    var = jnp.abs(jax.random.normal(k4, (c,), jnp.float32)) + 0.5
    scale = gamma / jnp.sqrt(var + eps)
    shift = beta - mean * scale
    return scale.reshape(1, c), shift.reshape(1, c)


def make_convblock_params(key, cin, cout, k, groups):
    kw_, kb = jax.random.split(key)
    w = 0.1 * jax.random.normal(kw_, (cout, cin // groups, k, k), jnp.float32)
    scale, shift = _bn_fold(kb, cout)
    return {'w': w, 'groups': groups, 'scale': scale, 'shift': shift}


def make_resnext_params(key, cin, cout, stride, r, first=False, cardinality=32):
    res = cout // 2
    keys = jax.random.split(key, 6)
    p = {
        'c1': make_convblock_params(keys[0], cin, res, 1, 1),
        'c2': make_convblock_params(keys[1], res, res, 3, cardinality),
        'c3': make_convblock_params(keys[2], res, cout, 1, 1),
        'se_w1': 0.1 * jax.random.normal(keys[3], (cout, cout // r), jnp.float32),
        'se_w2': 0.1 * jax.random.normal(keys[4], (cout // r, cout), jnp.float32),
        'stride': stride,
        'downsample': (stride == 2) or first,
    }
    if p['downsample']:
        p['p'] = make_convblock_params(keys[5], cin, cout, 1, 1)
    return p


# ----------------------- Pure-JAX reference (for correctness check) -----------------------

def _conv_ref(x, w, stride, pad, groups):
    return jax.lax.conv_general_dilated(
        x, jnp.transpose(w, (2, 3, 1, 0)), (stride, stride),
        [(pad, pad), (pad, pad)],
        dimension_numbers=('NHWC', 'HWIO', 'NHWC'),
        feature_group_count=groups)


def _convbn_ref(x, p, stride, pad, relu):
    y = _conv_ref(x, p['w'], stride, pad, p['groups'])
    y = y * p['scale'].reshape(1, 1, 1, -1) + p['shift'].reshape(1, 1, 1, -1)
    return jnp.maximum(y, 0.0) if relu else y


def resnext_ref(x_nchw, p):
    x = jnp.transpose(x_nchw, (0, 2, 3, 1)).astype(jnp.float32)
    f = _convbn_ref(x, p['c1'], 1, 0, True)
    f = _convbn_ref(f, p['c2'], p['stride'], 1, True)
    f = _convbn_ref(f, p['c3'], 1, 0, False)
    res = _convbn_ref(x, p['p'], p['stride'], 0, False) if p['downsample'] else x
    pooled = jnp.mean(f, axis=(1, 2))
    h = jnp.maximum(pooled @ p['se_w1'], 0.0)
    s = jax.nn.sigmoid(h @ p['se_w2'])
    out = jnp.maximum(f * s[:, None, None, :] + res, 0.0)
    return jnp.transpose(out, (0, 3, 1, 2))


# ----------------------- main -----------------------

if __name__ == "__main__":
    key = jax.random.PRNGKey(0)
    kx, kp = jax.random.split(key)

    # ResNeXtBlock(in_channels=32, out_channels=64, stride=2, r=16, cardinality=32)
    # -> res_channels = 32, grouped 3x3 with 32 groups (depthwise), downsample projection.
    N, Cin, H, W = 2, 32, 16, 16
    Cout, stride, r = 64, 2, 16

    x = jax.random.normal(kx, (N, Cin, H, W), jnp.float32)
    params = make_resnext_params(kp, Cin, Cout, stride, r, first=False, cardinality=32)

    out = jax.block_until_ready(resnext_block_forward(x, params))
    assert out.shape == (N, Cout, H // stride, W // stride), out.shape

    # Reference is pure f32; the kernel uses bf16 MXU operands (f32 accumulation),
    # so the comparison tolerance is set at bf16 level.
    ref = resnext_ref(x, params)
    np.testing.assert_allclose(np.asarray(out), np.asarray(ref), rtol=3e-2, atol=3e-2)

    print("KERNEL_OK")
</pallas_src>

<mosaic_0001>
module attributes {stable_mosaic.version = 11 : i64} {
  func.func @_resnext_block_kernel(%arg0: i32, %arg1: memref<1x256x32xbf16, #tpu.memory_space<vmem>>, %arg2: memref<32x32xbf16, #tpu.memory_space<vmem>>, %arg3: memref<1x32xf32, #tpu.memory_space<vmem>>, %arg4: memref<32x64xbf16, #tpu.memory_space<vmem>>, %arg5: memref<1x64xf32, #tpu.memory_space<vmem>>, %arg6: memref<9x1x32xf32, #tpu.memory_space<vmem>>, %arg7: memref<1x32xf32, #tpu.memory_space<vmem>>, %arg8: memref<32x64xbf16, #tpu.memory_space<vmem>>, %arg9: memref<1x64xf32, #tpu.memory_space<vmem>>, %arg10: memref<64x4xbf16, #tpu.memory_space<vmem>>, %arg11: memref<4x64xbf16, #tpu.memory_space<vmem>>, %arg12: memref<1x8x8x64xf32, #tpu.memory_space<vmem>>, %arg13: memref<4x9x9x32xf32, #tpu.memory_space<vmem>>) attributes {dimension_semantics = [#tpu.dimension_semantics<parallel>], iteration_bounds = array<i64: 2>, scalar_prefetch = 0 : i64, scratch_operands = 1 : i64, tpu.core_type = #tpu.core_type<tc>, window_params = [{transform_indices = @transform_0, window_bounds = array<i64: 1, 256, 32>}, {pipeline_mode = #tpu.pipeline_mode<synchronous>, transform_indices = @transform_1, window_bounds = array<i64: 32, 32>}, {pipeline_mode = #tpu.pipeline_mode<synchronous>, transform_indices = @transform_2, window_bounds = array<i64: 1, 32>}, {pipeline_mode = #tpu.pipeline_mode<synchronous>, transform_indices = @transform_3, window_bounds = array<i64: 32, 64>}, {pipeline_mode = #tpu.pipeline_mode<synchronous>, transform_indices = @transform_4, window_bounds = array<i64: 1, 64>}, {pipeline_mode = #tpu.pipeline_mode<synchronous>, transform_indices = @transform_5, window_bounds = array<i64: 9, 1, 32>}, {pipeline_mode = #tpu.pipeline_mode<synchronous>, transform_indices = @transform_6, window_bounds = array<i64: 1, 32>}, {pipeline_mode = #tpu.pipeline_mode<synchronous>, transform_indices = @transform_7, window_bounds = array<i64: 32, 64>}, {pipeline_mode = #tpu.pipeline_mode<synchronous>, transform_indices = @transform_8, window_bounds = array<i64: 1, 64>}, {pipeline_mode = #tpu.pipeline_mode<synchronous>, transform_indices = @transform_9, window_bounds = array<i64: 64, 4>}, {pipeline_mode = #tpu.pipeline_mode<synchronous>, transform_indices = @transform_10, window_bounds = array<i64: 4, 64>}, {transform_indices = @transform_11, window_bounds = array<i64: 1, 8, 8, 64>}]} {
    %c0 = arith.constant 0 : index
    %c0_0 = arith.constant 0 : index
    %c0_1 = arith.constant 0 : index
    %0 = vector.load %arg1[%c0, %c0_0, %c0_1] : memref<1x256x32xbf16, #tpu.memory_space<vmem>>, vector<1x256x32xbf16>
    %1 = vector.shape_cast %0 : vector<1x256x32xbf16> to vector<256x32xbf16>
    %c0_2 = arith.constant 0 : index
    %c0_3 = arith.constant 0 : index
    %2 = vector.load %arg2[%c0_2, %c0_3] : memref<32x32xbf16, #tpu.memory_space<vmem>>, vector<32x32xbf16>
    %cst = arith.constant dense<0.000000e+00> : vector<256x32xf32>
    %3 = tpu.matmul %1, %2, %cst {dimension_numbers = #tpu.dot_dimension_numbers<[1], [0], [0], [1], [0, 0, 1, 1], [], []>} : vector<256x32xbf16>, vector<32x32xbf16>, vector<256x32xf32> -> vector<256x32xf32>
    %c0_4 = arith.constant 0 : index
    %c0_5 = arith.constant 0 : index
    %4 = vector.load %arg3[%c0_4, %c0_5] : memref<1x32xf32, #tpu.memory_space<vmem>>, vector<1x32xf32>
    %5 = vector.broadcast %4 : vector<1x32xf32> to vector<256x32xf32>
    %6 = arith.addf %3, %5 : vector<256x32xf32>
    %cst_6 = arith.constant 0.000000e+00 : f32
    %7 = vector.broadcast %cst_6 : f32 to vector<256x32xf32>
    %8 = arith.maximumf %6, %7 : vector<256x32xf32>
    %cst_7 = arith.constant 0.000000e+00 : f32
    %9 = vector.broadcast %cst_7 : f32 to vector<4x9x9x32xf32>
    %c0_8 = arith.constant 0 : index
    %c0_9 = arith.constant 0 : index
    %c0_10 = arith.constant 0 : index
    %c0_11 = arith.constant 0 : index
    %10 = vector.load %arg13[%c0_8, %c0_9, %c0_10, %c0_11] : memref<4x9x9x32xf32, #tpu.memory_space<vmem>>, vector<4x9x9x32xf32>
    tpu.vector_store %arg13[%c0_8, %c0_9, %c0_10, %c0_11], %9 {strides = array<i32>} : memref<4x9x9x32xf32, #tpu.memory_space<vmem>>, vector<4x9x9x32xf32>,
    %11 = vector.shape_cast %8 : vector<256x32xf32> to vector<4x8x8x32xf32>
    %c0_12 = arith.constant 0 : index
    %c1 = arith.constant 1 : index
    %c1_13 = arith.constant 1 : index
    %c0_14 = arith.constant 0 : index
    %12 = vector.load %arg13[%c0_12, %c1, %c1_13, %c0_14] : memref<4x9x9x32xf32, #tpu.memory_space<vmem>>, vector<4x8x8x32xf32>
    tpu.vector_store %arg13[%c0_12, %c1, %c1_13, %c0_14], %11 {strides = array<i32>} : memref<4x9x9x32xf32, #tpu.memory_space<vmem>>, vector<4x8x8x32xf32>,
    %c3 = arith.constant 3 : index
    %c0_15 = arith.constant 0 : index
    %c0_16 = arith.constant 0 : index
    %c0_17 = arith.constant 0 : index
    %13 = vector.load %arg13[%c3, %c0_15, %c0_16, %c0_17] : memref<4x9x9x32xf32, #tpu.memory_space<vmem>>, vector<1x8x8x32xf32>
    %14 = vector.shape_cast %13 : vector<1x8x8x32xf32> to vector<8x8x32xf32>
    %c0_18 = arith.constant 0 : index
    %c0_19 = arith.constant 0 : index
    %c0_20 = arith.constant 0 : index
    %15 = vector.load %arg6[%c0_18, %c0_19, %c0_20] : memref<9x1x32xf32, #tpu.memory_space<vmem>>, vector<1x1x32xf32>
    %16 = vector.shape_cast %15 : vector<1x1x32xf32> to vector<1x32xf32>
    %17 = vector.shape_cast %16 : vector<1x32xf32> to vector<1x1x32xf32>
    %18 = vector.broadcast %17 : vector<1x1x32xf32> to vector<8x8x32xf32>
    %19 = arith.mulf %14, %18 : vector<8x8x32xf32>
    %c2 = arith.constant 2 : index
    %c0_21 = arith.constant 0 : index
    %c1_22 = arith.constant 1 : index
    %c0_23 = arith.constant 0 : index
    %20 = vector.load %arg13[%c2, %c0_21, %c1_22, %c0_23] : memref<4x9x9x32xf32, #tpu.memory_space<vmem>>, vector<1x8x8x32xf32>
    %21 = vector.shape_cast %20 : vector<1x8x8x32xf32> to vector<8x8x32xf32>
    %c1_24 = arith.constant 1 : index
    %c0_25 = arith.constant 0 : index
    %c0_26 = arith.constant 0 : index
    %22 = vector.load %arg6[%c1_24, %c0_25, %c0_26] : memref<9x1x32xf32, #tpu.memory_space<vmem>>, vector<1x1x32xf32>
    %23 = vector.shape_cast %22 : vector<1x1x32xf32> to vector<1x32xf32>
    %24 = vector.shape_cast %23 : vector<1x32xf32> to vector<1x1x32xf32>
    %25 = vector.broadcast %24 : vector<1x1x32xf32> to vector<8x8x32xf32>
    %26 = arith.mulf %21, %25 : vector<8x8x32xf32>
    %27 = arith.addf %19, %26 : vector<8x8x32xf32>
    %c3_27 = arith.constant 3 : index
    %c0_28 = arith.constant 0 : index
    %c1_29 = arith.constant 1 : index
    %c0_30 = arith.constant 0 : index
    %28 = vector.load %arg13[%c3_27, %c0_28, %c1_29, %c0_30] : memref<4x9x9x32xf32, #tpu.memory_space<vmem>>, vector<1x8x8x32xf32>
    %29 = vector.shape_cast %28 : vector<1x8x8x32xf32> to vector<8x8x32xf32>
    %c2_31 = arith.constant 2 : index
    %c0_32 = arith.constant 0 : index
    %c0_33 = arith.constant 0 : index
    %30 = vector.load %arg6[%c2_31, %c0_32, %c0_33] : memref<9x1x32xf32, #tpu.memory_space<vmem>>, vector<1x1x32xf32>
    %31 = vector.shape_cast %30 : vector<1x1x32xf32> to vector<1x32xf32>
    %32 = vector.shape_cast %31 : vector<1x32xf32> to vector<1x1x32xf32>
    %33 = vector.broadcast %32 : vector<1x1x32xf32> to vector<8x8x32xf32>
    %34 = arith.mulf %29, %33 : vector<8x8x32xf32>
    %35 = arith.addf %27, %34 : vector<8x8x32xf32>
    %c1_34 = arith.constant 1 : index
    %c1_35 = arith.constant 1 : index
    %c0_36 = arith.constant 0 : index
    %c0_37 = arith.constant 0 : index
    %36 = vector.load %arg13[%c1_34, %c1_35, %c0_36, %c0_37] : memref<4x9x9x32xf32, #tpu.memory_space<vmem>>, vector<1x8x8x32xf32>
    %37 = vector.shape_cast %36 : vector<1x8x8x32xf32> to vector<8x8x32xf32>
    %c3_38 = arith.constant 3 : index
    %c0_39 = arith.constant 0 : index
    %c0_40 = arith.constant 0 : index
    %38 = vector.load %arg6[%c3_38, %c0_39, %c0_40] : memref<9x1x32xf32, #tpu.memory_space<vmem>>, vector<1x1x32xf32>
    %39 = vector.shape_cast %38 : vector<1x1x32xf32> to vector<1x32xf32>
    %40 = vector.shape_cast %39 : vector<1x32xf32> to vector<1x1x32xf32>
    %41 = vector.broadcast %40 : vector<1x1x32xf32> to vector<8x8x32xf32>
    %42 = arith.mulf %37, %41 : vector<8x8x32xf32>
    %43 = arith.addf %35, %42 : vector<8x8x32xf32>
    %c0_41 = arith.constant 0 : index
    %c1_42 = arith.constant 1 : index
    %c1_43 = arith.constant 1 : index
    %c0_44 = arith.constant 0 : index
    %44 = vector.load %arg13[%c0_41, %c1_42, %c1_43, %c0_44] : memref<4x9x9x32xf32, #tpu.memory_space<vmem>>, vector<1x8x8x32xf32>
    %45 = vector.shape_cast %44 : vector<1x8x8x32xf32> to vector<8x8x32xf32>
    %c4 = arith.constant 4 : index
    %c0_45 = arith.constant 0 : index
    %c0_46 = arith.constant 0 : index
    %46 = vector.load %arg6[%c4, %c0_45, %c0_46] : memref<9x1x32xf32, #tpu.memory_space<vmem>>, vector<1x1x32xf32>
    %47 = vector.shape_cast %46 : vector<1x1x32xf32> to vector<1x32xf32>
    %48 = vector.shape_cast %47 : vector<1x32xf32> to vector<1x1x32xf32>
    %49 = vector.broadcast %48 : vector<1x1x32xf32> to vector<8x8x32xf32>
    %50 = arith.mulf %45, %49 : vector<8x8x32xf32>
    %51 = arith.addf %43, %50 : vector<8x8x32xf32>
    %c1_47 = arith.constant 1 : index
    %c1_48 = arith.constant 1 : index
    %c1_49 = arith.constant 1 : index
    %c0_50 = arith.constant 0 : index
    %52 = vector.load %arg13[%c1_47, %c1_48, %c1_49, %c0_50] : memref<4x9x9x32xf32, #tpu.memory_space<vmem>>, vector<1x8x8x32xf32>
    %53 = vector.shape_cast %52 : vector<1x8x8x32xf32> to vector<8x8x32xf32>
    %c5 = arith.constant 5 : index
    %c0_51 = arith.constant 0 : index
    %c0_52 = arith.constant 0 : index
    %54 = vector.load %arg6[%c5, %c0_51, %c0_52] : memref<9x1x32xf32, #tpu.memory_space<vmem>>, vector<1x1x32xf32>
    %55 = vector.shape_cast %54 : vector<1x1x32xf32> to vector<1x32xf32>
    %56 = vector.shape_cast %55 : vector<1x32xf32> to vector<1x1x32xf32>
    %57 = vector.broadcast %56 : vector<1x1x32xf32> to vector<8x8x32xf32>
    %58 = arith.mulf %53, %57 : vector<8x8x32xf32>
    %59 = arith.addf %51, %58 : vector<8x8x32xf32>
    %c3_53 = arith.constant 3 : index
    %c1_54 = arith.constant 1 : index
    %c0_55 = arith.constant 0 : index
    %c0_56 = arith.constant 0 : index
    %60 = vector.load %arg13[%c3_53, %c1_54, %c0_55, %c0_56] : memref<4x9x9x32xf32, #tpu.memory_space<vmem>>, vector<1x8x8x32xf32>
    %61 = vector.shape_cast %60 : vector<1x8x8x32xf32> to vector<8x8x32xf32>
    %c6 = arith.constant 6 : index
    %c0_57 = arith.constant 0 : index
    %c0_58 = arith.constant 0 : index
    %62 = vector.load %arg6[%c6, %c0_57, %c0_58] : memref<9x1x32xf32, #tpu.memory_space<vmem>>, vector<1x1x32xf32>
    %63 = vector.shape_cast %62 : vector<1x1x32xf32> to vector<1x32xf32>
    %64 = vector.shape_cast %63 : vector<1x32xf32> to vector<1x1x32xf32>
    %65 = vector.broadcast %64 : vector<1x1x32xf32> to vector<8x8x32xf32>
    %66 = arith.mulf %61, %65 : vector<8x8x32xf32>
    %67 = arith.addf %59, %66 : vector<8x8x32xf32>
    %c2_59 = arith.constant 2 : index
    %c1_60 = arith.constant 1 : index
    %c1_61 = arith.constant 1 : index
    %c0_62 = arith.constant 0 : index
    %68 = vector.load %arg13[%c2_59, %c1_60, %c1_61, %c0_62] : memref<4x9x9x32xf32, #tpu.memory_space<vmem>>, vector<1x8x8x32xf32>
    %69 = vector.shape_cast %68 : vector<1x8x8x32xf32> to vector<8x8x32xf32>
    %c7 = arith.constant 7 : index
    %c0_63 = arith.constant 0 : index
    %c0_64 = arith.constant 0 : index
    %70 = vector.load %arg6[%c7, %c0_63, %c0_64] : memref<9x1x32xf32, #tpu.memory_space<vmem>>, vector<1x1x32xf32>
    %71 = vector.shape_cast %70 : vector<1x1x32xf32> to vector<1x32xf32>
    %72 = vector.shape_cast %71 : vector<1x32xf32> to vector<1x1x32xf32>
    %73 = vector.broadcast %72 : vector<1x1x32xf32> to vector<8x8x32xf32>
    %74 = arith.mulf %69, %73 : vector<8x8x32xf32>
    %75 = arith.addf %67, %74 : vector<8x8x32xf32>
    %c3_65 = arith.constant 3 : index
    %c1_66 = arith.constant 1 : index
    %c1_67 = arith.constant 1 : index
    %c0_68 = arith.constant 0 : index
    %76 = vector.load %arg13[%c3_65, %c1_66, %c1_67, %c0_68] : memref<4x9x9x32xf32, #tpu.memory_space<vmem>>, vector<1x8x8x32xf32>
    %77 = vector.shape_cast %76 : vector<1x8x8x32xf32> to vector<8x8x32xf32>
    %c8 = arith.constant 8 : index
    %c0_69 = arith.constant 0 : index
    %c0_70 = arith.constant 0 : index
    %78 = vector.load %arg6[%c8, %c0_69, %c0_70] : memref<9x1x32xf32, #tpu.memory_space<vmem>>, vector<1x1x32xf32>
    %79 = vector.shape_cast %78 : vector<1x1x32xf32> to vector<1x32xf32>
    %80 = vector.shape_cast %79 : vector<1x32xf32> to vector<1x1x32xf32>
    %81 = vector.broadcast %80 : vector<1x1x32xf32> to vector<8x8x32xf32>
    %82 = arith.mulf %77, %81 : vector<8x8x32xf32>
    %83 = arith.addf %75, %82 : vector<8x8x32xf32>
    %84 = vector.shape_cast %83 : vector<8x8x32xf32> to vector<64x32xf32>
    %c0_71 = arith.constant 0 : index
    %c0_72 = arith.constant 0 : index
    %85 = vector.load %arg7[%c0_71, %c0_72] : memref<1x32xf32, #tpu.memory_space<vmem>>, vector<1x32xf32>
    %86 = vector.broadcast %85 : vector<1x32xf32> to vector<64x32xf32>
    %87 = arith.addf %84, %86 : vector<64x32xf32>
    %cst_73 = arith.constant 0.000000e+00 : f32
    %88 = vector.broadcast %cst_73 : f32 to vector<64x32xf32>
    %89 = arith.maximumf %87, %88 : vector<64x32xf32>
    %90 = arith.truncf %89 : vector<64x32xf32> to vector<64x32xbf16>
    %c0_74 = arith.constant 0 : index
    %c0_75 = arith.constant 0 : index
    %91 = vector.load %arg8[%c0_74, %c0_75] : memref<32x64xbf16, #tpu.memory_space<vmem>>, vector<32x64xbf16>
    %cst_76 = arith.constant dense<0.000000e+00> : vector<64x64xf32>
    %92 = tpu.matmul %90, %91, %cst_76 {dimension_numbers = #tpu.dot_dimension_numbers<[1], [0], [0], [1], [0, 0, 1, 1], [], []>} : vector<64x32xbf16>, vector<32x64xbf16>, vector<64x64xf32> -> vector<64x64xf32>
    %c0_77 = arith.constant 0 : index
    %c0_78 = arith.constant 0 : index
    %93 = vector.load %arg9[%c0_77, %c0_78] : memref<1x64xf32, #tpu.memory_space<vmem>>, vector<1x64xf32>
    %94 = vector.broadcast %93 : vector<1x64xf32> to vector<64x64xf32>
    %95 = arith.addf %92, %94 : vector<64x64xf32>
    %96 = vector.extract_strided_slice %1 {offsets = [0, 0], sizes = [64, 32], strides = [1, 1]} : vector<256x32xbf16> to vector<64x32xbf16>
    %c0_79 = arith.constant 0 : index
    %c0_80 = arith.constant 0 : index
    %97 = vector.load %arg4[%c0_79, %c0_80] : memref<32x64xbf16, #tpu.memory_space<vmem>>, vector<32x64xbf16>
    %cst_81 = arith.constant dense<0.000000e+00> : vector<64x64xf32>
    %98 = tpu.matmul %96, %97, %cst_81 {dimension_numbers = #tpu.dot_dimension_numbers<[1], [0], [0], [1], [0, 0, 1, 1], [], []>} : vector<64x32xbf16>, vector<32x64xbf16>, vector<64x64xf32> -> vector<64x64xf32>
    %c0_82 = arith.constant 0 : index
    %c0_83 = arith.constant 0 : index
    %99 = vector.load %arg5[%c0_82, %c0_83] : memref<1x64xf32, #tpu.memory_space<vmem>>, vector<1x64xf32>
    %100 = vector.broadcast %99 : vector<1x64xf32> to vector<64x64xf32>
    %101 = arith.addf %98, %100 : vector<64x64xf32>
    %cst_84 = arith.constant dense<0.000000e+00> : vector<64xf32>
    %102 = vector.multi_reduction <add>, %95, %cst_84 [0] : vector<64x64xf32> to vector<64xf32>
    %103 = vector.shape_cast %102 : vector<64xf32> to vector<1x64xf32>
    %cst_85 = arith.constant 6.400000e+01 : f32
    %104 = vector.broadcast %cst_85 : f32 to vector<1x64xf32>
    %105 = arith.divf %103, %104 : vector<1x64xf32>
    %106 = arith.truncf %105 : vector<1x64xf32> to vector<1x64xbf16>
    %c0_86 = arith.constant 0 : index
    %c0_87 = arith.constant 0 : index
    %107 = vector.load %arg10[%c0_86, %c0_87] : memref<64x4xbf16, #tpu.memory_space<vmem>>, vector<64x4xbf16>
    %cst_88 = arith.constant dense<0.000000e+00> : vector<1x4xf32>
    %108 = tpu.matmul %106, %107, %cst_88 {dimension_numbers = #tpu.dot_dimension_numbers<[1], [0], [0], [1], [0, 0, 1, 1], [], []>} : vector<1x64xbf16>, vector<64x4xbf16>, vector<1x4xf32> -> vector<1x4xf32>
    %cst_89 = arith.constant 0.000000e+00 : f32
    %109 = vector.broadcast %cst_89 : f32 to vector<1x4xf32>
    %110 = arith.maximumf %108, %109 : vector<1x4xf32>
    %111 = arith.truncf %110 : vector<1x4xf32> to vector<1x4xbf16>
    %c0_90 = arith.constant 0 : index
    %c0_91 = arith.constant 0 : index
    %112 = vector.load %arg11[%c0_90, %c0_91] : memref<4x64xbf16, #tpu.memory_space<vmem>>, vector<4x64xbf16>
    %cst_92 = arith.constant dense<0.000000e+00> : vector<1x64xf32>
    %113 = tpu.matmul %111, %112, %cst_92 {dimension_numbers = #tpu.dot_dimension_numbers<[1], [0], [0], [1], [0, 0, 1, 1], [], []>} : vector<1x4xbf16>, vector<4x64xbf16>, vector<1x64xf32> -> vector<1x64xf32>
    %cst_93 = arith.constant 0.000000e+00 : f32
    %114 = vector.broadcast %cst_93 : f32 to vector<1x64xf32>
    %115 = arith.subf %114, %113 : vector<1x64xf32>
    %116 = math.exp %115 : vector<1x64xf32>
    %cst_94 = arith.constant 1.000000e+00 : f32
    %117 = vector.broadcast %cst_94 : f32 to vector<1x64xf32>
    %118 = arith.addf %117, %116 : vector<1x64xf32>
    %cst_95 = arith.constant 1.000000e+00 : f32
    %119 = vector.broadcast %cst_95 : f32 to vector<1x64xf32>
    %120 = arith.divf %119, %118 : vector<1x64xf32>
    %121 = vector.broadcast %120 : vector<1x64xf32> to vector<64x64xf32>
    %122 = arith.mulf %95, %121 : vector<64x64xf32>
    %123 = arith.addf %122, %101 : vector<64x64xf32>
    %cst_96 = arith.constant 0.000000e+00 : f32
    %124 = vector.broadcast %cst_96 : f32 to vector<64x64xf32>
    %125 = arith.maximumf %123, %124 : vector<64x64xf32>
    %126 = vector.shape_cast %125 : vector<64x64xf32> to vector<8x8x64xf32>
    %c0_97 = arith.constant 0 : index
    %c0_98 = arith.constant 0 : index
    %c0_99 = arith.constant 0 : index
    %c0_100 = arith.constant 0 : index
    %127 = vector.load %arg12[%c0_97, %c0_98, %c0_99, %c0_100] : memref<1x8x8x64xf32, #tpu.memory_space<vmem>>, vector<1x8x8x64xf32>
    %128 = vector.shape_cast %127 : vector<1x8x8x64xf32> to vector<8x8x64xf32>
    %129 = vector.shape_cast %126 : vector<8x8x64xf32> to vector<1x8x8x64xf32>
    tpu.vector_store %arg12[%c0_97, %c0_98, %c0_99, %c0_100], %129 {strides = array<i32>} : memref<1x8x8x64xf32, #tpu.memory_space<vmem>>, vector<1x8x8x64xf32>,
    return
  }
  func.func @transform_0(%arg0: i32) -> (i32, i32, i32) {
    %c0_i32 = arith.constant 0 : i32
    %c0_i32_0 = arith.constant 0 : i32
    %c0_i32_1 = arith.constant 0 : i32
    return %arg0, %c0_i32, %c0_i32_0 : i32, i32, i32
  }
  func.func @transform_1(%arg0: i32) -> (i32, i32) {
    %c0_i32 = arith.constant 0 : i32
    %c0_i32_0 = arith.constant 0 : i32
    %c0_i32_1 = arith.constant 0 : i32
    return %c0_i32, %c0_i32_0 : i32, i32
  }
  func.func @transform_2(%arg0: i32) -> (i32, i32) {
    %c0_i32 = arith.constant 0 : i32
    %c0_i32_0 = arith.constant 0 : i32
    %c0_i32_1 = arith.constant 0 : i32
    return %c0_i32, %c0_i32_0 : i32, i32
  }
  func.func @transform_3(%arg0: i32) -> (i32, i32) {
    %c0_i32 = arith.constant 0 : i32
    %c0_i32_0 = arith.constant 0 : i32
    %c0_i32_1 = arith.constant 0 : i32
    return %c0_i32, %c0_i32_0 : i32, i32
  }
  func.func @transform_4(%arg0: i32) -> (i32, i32) {
    %c0_i32 = arith.constant 0 : i32
    %c0_i32_0 = arith.constant 0 : i32
    %c0_i32_1 = arith.constant 0 : i32
    return %c0_i32, %c0_i32_0 : i32, i32
  }
  func.func @transform_5(%arg0: i32) -> (i32, i32, i32) {
    %c0_i32 = arith.constant 0 : i32
    %c0_i32_0 = arith.constant 0 : i32
    %c0_i32_1 = arith.constant 0 : i32
    %c0_i32_2 = arith.constant 0 : i32
    return %c0_i32, %c0_i32_0, %c0_i32_1 : i32, i32, i32
  }
  func.func @transform_6(%arg0: i32) -> (i32, i32) {
    %c0_i32 = arith.constant 0 : i32
    %c0_i32_0 = arith.constant 0 : i32
    %c0_i32_1 = arith.constant 0 : i32
    return %c0_i32, %c0_i32_0 : i32, i32
  }
  func.func @transform_7(%arg0: i32) -> (i32, i32) {
    %c0_i32 = arith.constant 0 : i32
    %c0_i32_0 = arith.constant 0 : i32
    %c0_i32_1 = arith.constant 0 : i32
    return %c0_i32, %c0_i32_0 : i32, i32
  }
  func.func @transform_8(%arg0: i32) -> (i32, i32) {
    %c0_i32 = arith.constant 0 : i32
    %c0_i32_0 = arith.constant 0 : i32
    %c0_i32_1 = arith.constant 0 : i32
    return %c0_i32, %c0_i32_0 : i32, i32
  }
  func.func @transform_9(%arg0: i32) -> (i32, i32) {
    %c0_i32 = arith.constant 0 : i32
    %c0_i32_0 = arith.constant 0 : i32
    %c0_i32_1 = arith.constant 0 : i32
    return %c0_i32, %c0_i32_0 : i32, i32
  }
  func.func @transform_10(%arg0: i32) -> (i32, i32) {
    %c0_i32 = arith.constant 0 : i32
    %c0_i32_0 = arith.constant 0 : i32
    %c0_i32_1 = arith.constant 0 : i32
    return %c0_i32, %c0_i32_0 : i32, i32
  }
  func.func @transform_11(%arg0: i32) -> (i32, i32, i32, i32) {
    %c0_i32 = arith.constant 0 : i32
    %c0_i32_0 = arith.constant 0 : i32
    %c0_i32_1 = arith.constant 0 : i32
    %c0_i32_2 = arith.constant 0 : i32
    return %arg0, %c0_i32, %c0_i32_0, %c0_i32_1 : i32, i32, i32, i32
  }
}

</mosaic_0001>

<bundles_post_ra>
// kernel: tpu_custom_call.1
= control target key start
LH: loop header
LB: loop body
LE: loop exit
PB: predicated region body
PF: predicated region fallthrough
CT: control target
= control target key end

     0   :  { %16 = vsyncpa [#allocation4], 0  ;;  %s2713_s0 = inlined_call_operand.vmem [shape: bf16[2,256,32], index: 0, kind: input, shape index: {}]   ;;  %s2714_s1 = inlined_call_operand.vmem [shape: bf16[32,32], index: 1, kind: input, shape index: {}]   ;;  %s2715_s2 = inlined_call_operand.vmem [shape: f32[1,32], index: 2, kind: input, shape index: {}]   ;;  %s2716_s3 = inlined_call_operand.vmem [shape: bf16[32,64], index: 3, kind: input, shape index: {}]   ;;  %s2717_s4 = inlined_call_operand.vmem [shape: f32[1,64], index: 4, kind: input, shape index: {}]   ;;  %s2718_s5 = inlined_call_operand.vmem [shape: f32[9,1,32], index: 5, kind: input, shape index: {}]   ;;  %s2719_s6 = inlined_call_operand.vmem [shape: f32[1,32], index: 6, kind: input, shape index: {}]   ;;  %s2720_s7 = inlined_call_operand.vmem [shape: bf16[32,64], index: 7, kind: input, shape index: {}]   ;;  %s2721_s8 = inlined_call_operand.vmem [shape: f32[1,64], index: 8, kind: input, shape index: {}]   ;;  %s2722_s9 = inlined_call_operand.vmem [shape: bf16[64,4], index: 9, kind: input, shape index: {}]   ;;  %s2723_s10 = inlined_call_operand.vmem [shape: bf16[4,64], index: 10, kind: input, shape index: {}]   ;;  %s2724_s11 = inlined_call_operand.hbm [shape: f32[2,8,8,64], index: 11, kind: output, shape index: {}]  }
   0x1   :  { %18 = vsyncpa [#allocation4 + $0x1], 0  ;;  %s2045_s17 = smov 0   ;;  %s2047_s18 = smov 0  }
   0x2   :  { %s2049_s19 = smov 0   ;;  %s2051_s20 = smov 0  }
   0x3 LB: > { %s2066_s21 = sadd.s32 4294967295, %s1978_s20   ;;  %s1637_s22 = sadd.s32 4294967294, %s1978_s20   ;;  %s1978_s20 = sphi %s2051_s20, %s2766_s20   ;;  %s1974_s19 = sphi %s2049_s19, %s2765_s19   ;;  %s1970_s18 = sphi %s2047_s18, %s2764_s18   ;;  %s1966_s17 = sphi %s2045_s17, %s2763_s17  }
   0x4   : > { %s2070_s23 = sadd.s32 1, %s1978_s20   ;;  %s267_s24 = sadd.s32 1, %s1974_s19 }
   0x5   : > { %s264_s25 = ssub.s32 %s1978_s20, %s2070_s23  ;;  %p277_p0 = scmp.ne.s32.totalorder %s1974_s19, %s1970_s18 }
   0x6   : > { %p265_p1 = scmp.eq.s32.totalorder %s264_s25, 0  ;;  %p278_p2 = scmp.eq.s32.totalorder %s2066_s21, 1 }
   0x7   : > { %p283_p3 = scmp.ne.s32.totalorder %s1970_s18, %s1966_s17  ;;  %p284_p4 = scmp.eq.s32.totalorder %s1637_s22, 1 }
   0x8   : > { %s2081_s26 = scalar_select %p265_p1, %s1974_s19, %s267_s24  }
   0x9   : > { %p2083_p5 = por %p278_p2, %p277_p0  ;;  %p2087_p6 = por %p284_p4, %p283_p3 }
   0xa   : > { %p1640_p7 = scmp.ge.s32.totalorder %s1978_s20, 1  ;;  %p340_p8 = scmp.lt.s32.totalorder %s1978_s20, 3 }
   0xc   : > { %p341_p9 = pnand %p1640_p7, %p340_p8 }
   0xe   : > { %344 = sbr.rel (%p341_p9) target bundleno = 1059 (0x423), region = 64 }
  0x15   : > { %v1886_v0 = vld [vmem:[%s2714_s1] sm:$0xff]   ;;  %p380_p10 = scmp.lt.s32.totalorder %s2066_s21, 1  ;;  %v1887_v1 = vld [vmem:[%s2714_s1 + $0x8] sm:$0xff]   ;;  %vm521_vm0 = vcmask 261120   ;;  %vm764_vm1 = vcmask 253952   ;;  %v2725_v18 = vmov 0.0  }
  0x16   : > { %1761 = vmatprep.subr.bf16.mxu0 %v1886_v0  ;;  %1839 = vmatprep.subr.bf16.mxu1 %v1886_v0  ;;  %770 = vst.msk [vmem:[#allocation2 + $0x30] sm:$0xff] %vm521_vm0, %v2725_v18  ;;  %766 = vst.msk [vmem:[#allocation2 + $0x10] sm:$0xff] %vm521_vm0, %v2725_v18  ;;  %v1904_v19 = vld [vmem:[%s2720_s7] sm:$0xff]   ;;  %v1905_v20 = vld [vmem:[%s2720_s7 + $0x8] sm:$0xff]   ;;  %vm1981_vm2 = vmmov 0   ;;  %vm1368_vm3 = vcmask 523264  }
  0x17   : > { %s381_s14 = scalar_select %p380_p10, %s2066_s21, 1  ;;  %1762 = vmatpush3.bf16.msra.mxu0 %v1886_v0  ;;  %1841 = vmatpush3.bf16.msra.mxu1 %v1886_v0  ;;  %771 = vst.msk [vmem:[#allocation2 + $0x38] sm:$0x1] %vm764_vm1, %v2725_v18  ;;  %767 = vst.msk [vmem:[#allocation2 + $0x18] sm:$0x1] %vm764_vm1, %v2725_v18  ;;  %vm1475_vm4 = vcmask 1041408  }
  0x18   : > { %1763 = vmatprep.subr.bf16.mxu0 %v1887_v1  ;;  %1840 = vmatprep.subr.bf16.mxu1 %v1887_v1  ;;  %768 = vst.msk [vmem:[#allocation2 + $0x20] sm:$0xff] %vm521_vm0, %v2725_v18  ;;  %772 = vst.msk [vmem:[#allocation2 + $0x40] sm:$0xff] %vm521_vm0, %v2725_v18  ;;  %v2295_v21 = vld [vmem:[%s2715_s2] ss:$0 sm:$0xff]  ;;  %vm1471_vm5 = vcmask 31744   ;;  %s377_s30 = sand.u32 1, %s1970_s18  }
  0x19   : > { %s1722_s15 = sshll.u32 %s381_s14, 7  ;;  %769 = vst.msk [vmem:[#allocation2 + $0x28] sm:$0x1] %vm764_vm1, %v2725_v18  ;;  %773 = vst.msk [vmem:[#allocation2 + $0x48] sm:$0x1] %vm764_vm1, %v2725_v18  ;;  %s1641_s14 = sshll.u32 %s377_s30, 6 }
  0x1a   : > { %s2104_s24 = scalar_lea.vmem %s2713_s0, %s1722_s15  ;;  %774 = vst.msk [vmem:[#allocation2 + $0x50] sm:$0xff] %vm521_vm0, %v2725_v18  ;;  %776 = vst.msk [vmem:[#allocation2 + $0x60] sm:$0xff] %vm521_vm0, %v2725_v18  ;;  %s1723_s15 = sshll.u32 %s2066_s21, 10 }
  0x1b   : > { %v2107_v2 = vld [vmem:[%s2104_s24] sm:$0xff]   ;;  %1764 = vmatpush3.bf16.msra.mxu0 %v1887_v1  ;;  %v2110_v3 = vld [vmem:[%s2104_s24 + $0x8] sm:$0xff]   ;;  %1842 = vmatpush3.bf16.msra.mxu1 %v1887_v1  ;;  %v2115_v4 = vld [vmem:[%s2104_s24 + $0x10] sm:$0xff]   ;;  %775 = vst.msk [vmem:[#allocation2 + $0x58] sm:$0x1] %vm764_vm1, %v2725_v18  ;;  %s379_s16 = scalar_lea.vmem [#allocation3], %s1641_s14  ;;  %s2658_s29 = scalar_lea.hbm %s2724_s11, %s1723_s15 }
  0x1c   : > { %2736 = vst [vmem:[#allocation6_spill] sm:$0xff] %v2107_v2  ;;  %2737 = vst [vmem:[#allocation7_spill] sm:$0xff] %v2110_v3  ;;  %1765 = vmatprep.mubr.msk.bf16.mxu0 %vm521_vm0, %v2107_v2  ;;  %v2122_v5 = vld [vmem:[%s2104_s24 + $0x18] sm:$0xff]   ;;  %v1892_v6 = vld [vmem:[%s2104_s24 + $0x20] sm:$0xff]   ;;  %1797 = vmatprep.subr.bf16.mxu1 %v1904_v19  ;;  %s1575_s22 = sshll.u32 %s379_s16, 4  ;;  %s2672_s21 = scalar_lea.sflag [#allocation4], %s377_s30  ;;  %s2660_s22 = int_to_ptr.vmem [resolvable:$true] %s1575_s22 }
  0x1d   : > { %2738 = vst [vmem:[#allocation8_spill] sm:$0xff] %v2115_v4  ;;  %2739 = vst [vmem:[#allocation9_spill] sm:$0xff] %v2122_v5  ;;  %v1899_v7 = vld [vmem:[%s2104_s24 + $0x70] sm:$0xff]   ;;  %v1901_v8 = vld [vmem:[%s2104_s24 + $0x78] sm:$0xff]   ;;  %s1916_s12 = scalar_lea.vmem %s2660_s22, 1024  ;;  %s1982_s13 = smov [#allocation3]  }
  0x1e   : > { %1766 = vmatmul.mubr.msk.bf16.vlgmr.msra.gmra.mrb[0].mxu0 %vm521_vm0, %v2110_v3  ;;  %1793 = vmatprep.mubr.msk.bf16.mxu1 %vm521_vm0, %v1899_v7  ;;  %v1893_v9 = vld [vmem:[%s2104_s24 + $0x28] sm:$0xff]   ;;  %v1894_v10 = vld [vmem:[%s2104_s24 + $0x30] sm:$0xff]   ;;  %v1895_v11 = vld [vmem:[%s2104_s24 + $0x38] sm:$0xff]   ;;  %777 = vst.msk [vmem:[#allocation2 + $0x68] sm:$0x1] %vm764_vm1, %v2725_v18  ;;  %p1917_p11 = scmp.ne.s32.totalorder %s2660_s22, %s1916_s12  ;;  %s1920_s14 = sshll.u32 %s1982_s13, 4  ;;  %s1921_s14 = int_to_ptr.vmem [resolvable:$false] %s1920_s14 }
  0x1f   : > { %1769 = vmatprep.mubr.msk.bf16.mxu0 %vm521_vm0, %v2115_v4  ;;  %1794 = vmatmul.mubr.msk.bf16.vlgmr.msra.gmra.mrb[0].mxu1 %vm521_vm0, %v1901_v8  ;;  %v1896_v12 = vld [vmem:[%s2104_s24 + $0x40] sm:$0xff]   ;;  %v1897_v13 = vld [vmem:[%s2104_s24 + $0x48] sm:$0xff]   ;;  %v1898_v14 = vld [vmem:[%s2104_s24 + $0x50] sm:$0xff]   ;;  %778 = vst.msk [vmem:[#allocation2 + $0x70] sm:$0xff] %vm521_vm0, %v2725_v18  ;;  %s1922_s15 = scalar_lea.vmem %s1921_s14, 2048  ;;  %p1923_p0 = scmp.lt.s32.totalorder %s2660_s22, %s1921_s14 }
  0x20   : > { %v1900_v15 = vld [vmem:[%s2104_s24 + $0x58] sm:$0xff]   ;;  %v1902_v16 = vld [vmem:[%s2104_s24 + $0x60] sm:$0xff]   ;;  %v1903_v17 = vld [vmem:[%s2104_s24 + $0x68] sm:$0xff]   ;;  %779 = vst.msk [vmem:[#allocation2 + $0x78] sm:$0x1] %vm764_vm1, %v2725_v18  ;;  %1798 = vmatpush3.bf16.msra.mxu1 %v1904_v19  ;;  %p1918_p12 = pnand %p1917_p11, %p2083_p5  ;;  %p1924_p1 = scmp.lt.s32.totalorder %s1922_s15, %s1916_s12 }
  0x21   : > { %780 = vst.msk [vmem:[#allocation2 + $0x80] sm:$0xff] %vm521_vm0, %v2725_v18  ;;  %784 = vst.msk [vmem:[#allocation2 + $0xa0] sm:$0xff] %vm521_vm0, %v2725_v18  ;;  %1799 = vmatprep.subr.bf16.mxu1 %v1905_v20 }
  0x22   : > { %781 = vst.msk [vmem:[#allocation2 + $0x88] sm:$0x1] %vm764_vm1, %v2725_v18  ;;  %785 = vst.msk [vmem:[#allocation2 + $0xa8] sm:$0x1] %vm764_vm1, %v2725_v18  ;;  %p1919_p13 = pneg %p1918_p12  ;;  %p1925_p2 = por %p1924_p1, %p1923_p0 }
  0x23   : > { %786 = vst.msk [vmem:[#allocation2 + $0xb0] sm:$0xff] %vm521_vm0, %v2725_v18  ;;  %788 = vst.msk [vmem:[#allocation2 + $0xc0] sm:$0xff] %vm521_vm0, %v2725_v18 }
  0x24   : > { %787 = vst.msk [vmem:[#allocation2 + $0xb8] sm:$0x1] %vm764_vm1, %v2725_v18  ;;  %789 = vst.msk [vmem:[#allocation2 + $0xc8] sm:$0x1] %vm764_vm1, %v2725_v18  ;;  %1800 = vmatpush3.bf16.msra.mxu1 %v1905_v20  ;;  %p1926_p3 = pnand %p1925_p2, %p1919_p13 }
  0x25   : > { %790 = vst.msk [vmem:[#allocation2 + $0xd0] sm:$0xff] %vm521_vm0, %v2725_v18  ;;  %792 = vst.msk [vmem:[#allocation2 + $0xe0] sm:$0xff] %vm521_vm0, %v2725_v18 }
  0x26   : > { %1770 = vmatmul.mubr.msk.bf16.gmra.mrb[4].mxu0 %vm521_vm0, %v2122_v5  ;;  %791 = vst.msk [vmem:[#allocation2 + $0xd8] sm:$0x1] %vm764_vm1, %v2725_v18  ;;  %793 = vst.msk [vmem:[#allocation2 + $0xe8] sm:$0x1] %vm764_vm1, %v2725_v18 }
  0x27   : > { %1773 = vmatprep.mubr.msk.bf16.mxu0 %vm521_vm0, %v1892_v6  ;;  %794 = vst.msk [vmem:[#allocation2 + $0xf0] sm:$0xff] %vm521_vm0, %v2725_v18  ;;  %796 = vst.msk [vmem:[#allocation2 + $0x100] sm:$0xff] %vm521_vm0, %v2725_v18 }
  0x28   : > { %795 = vst.msk [vmem:[#allocation2 + $0xf8] sm:$0x1] %vm764_vm1, %v2725_v18  ;;  %797 = vst.msk [vmem:[#allocation2 + $0x108] sm:$0x1] %vm764_vm1, %v2725_v18 }
  0x29   : > { %798 = vst.msk [vmem:[#allocation2 + $0x110] sm:$0xff] %vm521_vm0, %v2725_v18  ;;  %800 = vst.msk [vmem:[#allocation2 + $0x120] sm:$0xff] %vm521_vm0, %v2725_v18 }
  0x2a   : > { %799 = vst.msk [vmem:[#allocation2 + $0x118] sm:$0x1] %vm764_vm1, %v2725_v18  ;;  %801 = vst.msk [vmem:[#allocation2 + $0x128] sm:$0x1] %vm764_vm1, %v2725_v18 }
  0x2b   : > { %802 = vst.msk [vmem:[#allocation2 + $0x130] sm:$0xff] %vm521_vm0, %v2725_v18  ;;  %804 = vst.msk [vmem:[#allocation2 + $0x140] sm:$0xff] %vm521_vm0, %v2725_v18 }
  0x2c   : > { %803 = vst.msk [vmem:[#allocation2 + $0x138] sm:$0x1] %vm764_vm1, %v2725_v18  ;;  %805 = vst.msk [vmem:[#allocation2 + $0x148] sm:$0x1] %vm764_vm1, %v2725_v18 }
  0x2d   : > { %806 = vst.msk [vmem:[#allocation2 + $0x150] sm:$0xff] %vm521_vm0, %v2725_v18  ;;  %808 = vst.msk [vmem:[#allocation2 + $0x160] sm:$0xff] %vm521_vm0, %v2725_v18 }
  0x2e   : > { %1774 = vmatmul.mubr.msk.bf16.gmra.mrb[8].mxu0 %vm521_vm0, %v1893_v9  ;;  %807 = vst.msk [vmem:[#allocation2 + $0x158] sm:$0x1] %vm764_vm1, %v2725_v18  ;;  %809 = vst.msk [vmem:[#allocation2 + $0x168] sm:$0x1] %vm764_vm1, %v2725_v18 }
  0x2f   : > { %1777 = vmatprep.mubr.msk.bf16.mxu0 %vm521_vm0, %v1894_v10  ;;  %810 = vst.msk [vmem:[#allocation2 + $0x170] sm:$0xff] %vm521_vm0, %v2725_v18  ;;  %812 = vst.msk [vmem:[#allocation2 + $0x180] sm:$0xff] %vm521_vm0, %v2725_v18 }
  0x30   : > { %811 = vst.msk [vmem:[#allocation2 + $0x178] sm:$0x1] %vm764_vm1, %v2725_v18  ;;  %813 = vst.msk [vmem:[#allocation2 + $0x188] sm:$0x1] %vm764_vm1, %v2725_v18 }
  0x31   : > { %814 = vst.msk [vmem:[#allocation2 + $0x190] sm:$0xff] %vm521_vm0, %v2725_v18  ;;  %816 = vst.msk [vmem:[#allocation2 + $0x1a0] sm:$0xff] %vm521_vm0, %v2725_v18 }
  0x32   : > { %815 = vst.msk [vmem:[#allocation2 + $0x198] sm:$0x1] %vm764_vm1, %v2725_v18  ;;  %817 = vst.msk [vmem:[#allocation2 + $0x1a8] sm:$0x1] %vm764_vm1, %v2725_v18 }
  0x33   : > { %818 = vst.msk [vmem:[#allocation2 + $0x1b0] sm:$0xff] %vm521_vm0, %v2725_v18  ;;  %820 = vst.msk [vmem:[#allocation2 + $0x1c0] sm:$0xff] %vm521_vm0, %v2725_v18 }
  0x34   : > { %819 = vst.msk [vmem:[#allocation2 + $0x1b8] sm:$0x1] %vm764_vm1, %v2725_v18  ;;  %821 = vst.msk [vmem:[#allocation2 + $0x1c8] sm:$0x1] %vm764_vm1, %v2725_v18 }
  0x35   : > { %822 = vst.msk [vmem:[#allocation2 + $0x1d0] sm:$0xff] %vm521_vm0, %v2725_v18  ;;  %824 = vst.msk [vmem:[#allocation2 + $0x1e0] sm:$0xff] %vm521_vm0, %v2725_v18 }
  0x36   : > { %1778 = vmatmul.mubr.msk.bf16.gmra.mrb[12].mxu0 %vm521_vm0, %v1895_v11  ;;  %823 = vst.msk [vmem:[#allocation2 + $0x1d8] sm:$0x1] %vm764_vm1, %v2725_v18  ;;  %825 = vst.msk [vmem:[#allocation2 + $0x1e8] sm:$0x1] %vm764_vm1, %v2725_v18 }
  0x37   : > { %1781 = vmatprep.mubr.msk.bf16.mxu0 %vm521_vm0, %v1896_v12  ;;  %826 = vst.msk [vmem:[#allocation2 + $0x1f0] sm:$0xff] %vm521_vm0, %v2725_v18  ;;  %828 = vst.msk [vmem:[#allocation2 + $0x200] sm:$0xff] %vm521_vm0, %v2725_v18 }
  0x38   : > { %827 = vst.msk [vmem:[#allocation2 + $0x1f8] sm:$0x1] %vm764_vm1, %v2725_v18  ;;  %829 = vst.msk [vmem:[#allocation2 + $0x208] sm:$0x1] %vm764_vm1, %v2725_v18 }
  0x39   : > { %830 = vst.msk [vmem:[#allocation2 + $0x210] sm:$0xff] %vm521_vm0, %v2725_v18  ;;  %832 = vst.msk [vmem:[#allocation2 + $0x220] sm:$0xff] %vm521_vm0, %v2725_v18 }
  0x3a   : > { %831 = vst.msk [vmem:[#allocation2 + $0x218] sm:$0x1] %vm764_vm1, %v2725_v18  ;;  %833 = vst.msk [vmem:[#allocation2 + $0x228] sm:$0x1] %vm764_vm1, %v2725_v18 }
  0x3b   : > { %834 = vst.msk [vmem:[#allocation2 + $0x230] sm:$0xff] %vm521_vm0, %v2725_v18 }
  0x3c   : > { %835 = vst.msk [vmem:[#allocation2 + $0x238] sm:$0x1] %vm764_vm1, %v2725_v18 }
  0x3e   : > { %1782 = vmatmul.mubr.msk.bf16.gmra.mrb[16].mxu0 %vm521_vm0, %v1897_v13 }
  0x3f   : > { %1785 = vmatprep.mubr.msk.bf16.mxu0 %vm521_vm0, %v1898_v14 }
  0x46   : > { %1786 = vmatmul.mubr.msk.bf16.gmra.mrb[20].mxu0 %vm521_vm0, %v1900_v15 }
  0x47   : > { %1789 = vmatprep.mubr.msk.bf16.mxu0 %vm521_vm0, %v1902_v16 }
  0x4e   : > { %1790 = vmatmul.mubr.msk.bf16.gmra.mrb[24].mxu0 %vm521_vm0, %v1903_v17 }
  0xf1   : > { %v1767_v22 = vpop.f32.mrb[0].mxu0 }
  0xf2   : > { %v613_v23 = vadd.f32 %v1767_v22, %v2295_v21  ;;  %v604_v24 = vpop.f32.mrb[1].mxu0  ;;  %v1795_v42 = vpop.f32.mrb[0].mxu1 }
  0xf3   : > { %v605_v25 = vadd.f32 %v2295_v21, %v604_v24  ;;  %v1768_v26 = vpop.f32.mrb[2].mxu0  ;;  %v725_v45 = vadd.f32 %v1795_v42, %v2295_v21  ;;  %v716_v46 = vpop.f32.mrb[1].mxu1  ;;  %v926_v42 = vld [vmem:[#allocation2 + $0x1b1] sm:$0xff] }
  0xf4   : > { %v733_v27 = vmax.f32 %v613_v23, 0.0  ;;  %v616_v28 = vadd.f32 %v1768_v26, %v2295_v21  ;;  %v607_v29 = vpop.f32.mrb[3].mxu0  ;;  %v717_v48 = vadd.f32 %v2295_v21, %v716_v46  ;;  %v1796_v49 = vpop.f32.mrb[2].mxu1 }
  0xf5   : > { %v731_v30 = vmax.f32 %v605_v25, 0.0  ;;  %v608_v31 = vadd.f32 %v2295_v21, %v607_v29  ;;  %v761_v51 = vmax.f32 %v725_v45, 0.0  ;;  %v728_v52 = vadd.f32 %v1796_v49, %v2295_v21  ;;  %v719_v53 = vpop.f32.mrb[3].mxu1 }
  0xf6   : > { %839 = vst.msk [vmem:[#allocation2 + $0x31] sm:$0xff] %vm521_vm0, %v733_v27  ;;  %v734_v32 = vmax.f32 %v616_v28, 0.0  ;;  %v759_v54 = vmax.f32 %v717_v48, 0.0  ;;  %v720_v55 = vadd.f32 %v2295_v21, %v719_v53  ;;  %v870_v27 = vld [vmem:[#allocation2 + $0x1b0] sm:$0xff]  ;;  %v1687_v53 = vld [vmem:[%s2718_s5 + $0x4] ss:$0 sm:$0xff] }
  0xf7   : > { %837 = vst.msk [vmem:[#allocation2 + $0x11] sm:$0xff] %vm521_vm0, %v731_v30  ;;  %v732_v33 = vmax.f32 %v608_v31, 0.0  ;;  %867 = vst.msk [vmem:[#allocation2 + $0x221] sm:$0xff] %vm521_vm0, %v761_v51  ;;  %v762_v57 = vmax.f32 %v728_v52, 0.0  ;;  %v2342_v30 = vld [vmem:[%s2718_s5] ss:$0 sm:$0xff] }
  0xf8   : > { %840 = vst.msk [vmem:[#allocation2 + $0x41] sm:$0xff] %vm521_vm0, %v734_v32  ;;  %865 = vst.msk [vmem:[#allocation2 + $0x201] sm:$0xff] %vm521_vm0, %v759_v54  ;;  %v760_v60 = vmax.f32 %v720_v55, 0.0  ;;  %v894_v31 = vld [vmem:[#allocation2 + $0x121] sm:$0xff] }
  0xf9   : > { %838 = vst.msk [vmem:[#allocation2 + $0x21] sm:$0xff] %vm521_vm0, %v732_v33  ;;  %v1771_v34 = vpop.f32.mrb[4].mxu0  ;;  %868 = vst.msk [vmem:[#allocation2 + $0x231] sm:$0xff] %vm521_vm0, %v762_v57  ;;  %v2347_v32 = vld [vmem:[%s2718_s5 + $0x1] ss:$0 sm:$0xff] }
  0xfa   : > { %v629_v35 = vadd.f32 %v1771_v34, %v2295_v21  ;;  %v620_v36 = vpop.f32.mrb[5].mxu0  ;;  %866 = vst.msk [vmem:[#allocation2 + $0x211] sm:$0xff] %vm521_vm0, %v760_v60  ;;  %v2368_v52 = vld [vmem:[%s2718_s5 + $0x3] ss:$0 sm:$0xff] }
  0xfb   : > { %v621_v37 = vadd.f32 %v2295_v21, %v620_v36  ;;  %v1772_v38 = vpop.f32.mrb[6].mxu0 }
  0xfc   : > { %v737_v39 = vmax.f32 %v629_v35, 0.0  ;;  %v632_v40 = vadd.f32 %v1772_v38, %v2295_v21  ;;  %v623_v41 = vpop.f32.mrb[7].mxu0 }
  0xfd   : > { %v735_v43 = vmax.f32 %v621_v37, 0.0  ;;  %v624_v44 = vadd.f32 %v2295_v21, %v623_v41 }
  0xfe   : > { %843 = vst.msk [vmem:[#allocation2 + $0x71] sm:$0xff] %vm521_vm0, %v737_v39  ;;  %v738_v47 = vmax.f32 %v632_v40, 0.0  ;;  %v885_v39 = vmul.f32 %v2342_v30, %v870_v27  ;;  %v910_v40 = vmul.f32 %v2347_v32, %v894_v31  ;;  %v991_v57 = vld [vmem:[#allocation2 + $0x11] sm:$0xff] }
  0xff   : > { %841 = vst.msk [vmem:[#allocation2 + $0x51] sm:$0xff] %vm521_vm0, %v735_v43  ;;  %v736_v50 = vmax.f32 %v624_v44, 0.0  ;;  %v2358_v43 = vld [vmem:[%s2718_s5 + $0x2] ss:$0 sm:$0xff] }
 0x100   : > { %844 = vst.msk [vmem:[#allocation2 + $0x81] sm:$0xff] %vm521_vm0, %v738_v47  ;;  %v918_v47 = vadd.f32 %v910_v40, %v885_v39  ;;  %v942_v48 = vmul.f32 %v2358_v43, %v926_v42  ;;  %v2418_v39 = vld [vmem:[%s2718_s5 + $0x8] ss:$0 sm:$0xff] }
 0x101   : > { %842 = vst.msk [vmem:[#allocation2 + $0x61] sm:$0xff] %vm521_vm0, %v736_v50  ;;  %v1775_v56 = vpop.f32.mrb[8].mxu0  ;;  %v1061_v42 = vld [vmem:[#allocation2 + $0x210] sm:$0xff] }
 0x102   : > { %v645_v58 = vadd.f32 %v1775_v56, %v2295_v21  ;;  %v636_v59 = vpop.f32.mrb[9].mxu0 }
 0x103   : > { %v637_v61 = vadd.f32 %v2295_v21, %v636_v59  ;;  %v1776_v62 = vpop.f32.mrb[10].mxu0  ;;  %v994_v59 = vld [vmem:[#allocation2 + $0x41] sm:$0xff] }
 0x104   : > { %v741_v63 = vmax.f32 %v645_v58, 0.0  ;;  %v648_v0 = vadd.f32 %v1776_v62, %v2295_v21  ;;  %v639_v1 = vpop.f32.mrb[11].mxu0  ;;  %v993_v58 = vld [vmem:[#allocation2 + $0x31] sm:$0xff]  ;;  %v992_v62 = vld [vmem:[#allocation2 + $0x21] sm:$0xff] }
 0x105   : > { %v739_v6 = vmax.f32 %v637_v61, 0.0  ;;  %v640_v7 = vadd.f32 %v2295_v21, %v639_v1 }
 0x106   : > { %847 = vst.msk [vmem:[#allocation2 + $0xc1] sm:$0xff] %vm521_vm0, %v741_v63  ;;  %v742_v8 = vmax.f32 %v648_v0, 0.0  ;;  %v995_v63 = vld [vmem:[#allocation2 + $0x51] sm:$0xff] }
 0x107   : > { %845 = vst.msk [vmem:[#allocation2 + $0xa1] sm:$0xff] %vm521_vm0, %v739_v6  ;;  %v740_v9 = vmax.f32 %v640_v7, 0.0  ;;  %v997_v0 = vld [vmem:[#allocation2 + $0x71] sm:$0xff]  ;;  %v950_v6 = vadd.f32 %v942_v48, %v918_v47 }
 0x108   : > { %848 = vst.msk [vmem:[#allocation2 + $0xd1] sm:$0xff] %vm521_vm0, %v742_v8  ;;  %v996_v8 = vld [vmem:[#allocation2 + $0x61] sm:$0xff] }
 0x109   : > { %846 = vst.msk [vmem:[#allocation2 + $0xb1] sm:$0xff] %vm521_vm0, %v740_v9  ;;  %v1779_v10 = vpop.f32.mrb[12].mxu0  ;;  %v877_v9 = vld [vmem:[#allocation2 + $0x220] sm:$0xff] }
 0x10a   : > { %v661_v11 = vadd.f32 %v1779_v10, %v2295_v21  ;;  %v652_v12 = vpop.f32.mrb[13].mxu0  ;;  %v998_v10 = vld [vmem:[#allocation2 + $0x81] sm:$0xff] }
 0x10b   : > { %v653_v13 = vadd.f32 %v2295_v21, %v652_v12  ;;  %v1780_v14 = vpop.f32.mrb[14].mxu0  ;;  %v2378_v12 = vmul.f32 %v1687_v53, %v993_v58  ;;  %v2400_v27 = vmul.f32 %v1687_v53, %v998_v10  ;;  %v891_v10 = vmul.f32 %v2342_v30, %v1061_v42 }
 0x10c   : > { %v745_v15 = vmax.f32 %v661_v11, 0.0  ;;  %v664_v16 = vadd.f32 %v1780_v14, %v2295_v21  ;;  %v655_v17 = vpop.f32.mrb[15].mxu0  ;;  %v1007_v14 = vmul.f32 %v1687_v53, %v991_v57 }
 0x10d   : > { %v743_v19 = vmax.f32 %v653_v13, 0.0  ;;  %v656_v20 = vadd.f32 %v2295_v21, %v655_v17  ;;  %v933_v13 = vld [vmem:[#allocation2 + $0x221] sm:$0xff] }
 0x10e   : > { %851 = vst.msk [vmem:[#allocation2 + $0x101] sm:$0xff] %vm521_vm0, %v745_v15  ;;  %v746_v22 = vmax.f32 %v664_v16, 0.0  ;;  %v959_v51 = vld [vmem:[#allocation2 + $0xa0] sm:$0xff]  ;;  %v2381_v15 = vmul.f32 %v1687_v53, %v992_v62  ;;  %v2383_v16 = vmul.f32 %v1687_v53, %v994_v59 }
 0x10f   : > { %849 = vst.msk [vmem:[#allocation2 + $0xe1] sm:$0xff] %vm521_vm0, %v743_v19  ;;  %v744_v23 = vmax.f32 %v656_v20, 0.0  ;;  %v975_v7 = vmul.f32 %v2368_v52, %v959_v51  ;;  %v875_v17 = vld [vmem:[#allocation2 + $0x200] sm:$0xff]  ;;  %v2385_v20 = vmul.f32 %v1687_v53, %v997_v0  ;;  %v962_v57 = vld [vmem:[#allocation2 + $0xd0] sm:$0xff] }
 0x110   : > { %852 = vst.msk [vmem:[#allocation2 + $0x111] sm:$0xff] %vm521_vm0, %v746_v22  ;;  %v931_v19 = vld [vmem:[#allocation2 + $0x201] sm:$0xff]  ;;  %v890_v40 = vmul.f32 %v2342_v30, %v875_v17  ;;  %v960_v62 = vld [vmem:[#allocation2 + $0xb0] sm:$0xff] }
 0x111   : > { %850 = vst.msk [vmem:[#allocation2 + $0xf1] sm:$0xff] %vm521_vm0, %v744_v23  ;;  %v1783_v24 = vpop.f32.mrb[16].mxu0  ;;  %v2391_v23 = vld [vmem:[%s2718_s5 + $0x6] ss:$0 sm:$0xff]  ;;  %v2427_v51 = vmul.f32 %v2418_v39, %v931_v19  ;;  %v1026_v0 = vld [vmem:[#allocation2 + $0xd1] sm:$0xff] }
 0x112   : > { %v677_v25 = vadd.f32 %v1783_v24, %v2295_v21  ;;  %v668_v26 = vpop.f32.mrb[17].mxu0  ;;  %v2393_v24 = vmul.f32 %v1687_v53, %v995_v63  ;;  %v961_v48 = vld [vmem:[#allocation2 + $0xc0] sm:$0xff]  ;;  %v2434_v58 = vmul.f32 %v2391_v23, %v1061_v42 }
 0x113   : > { %v669_v28 = vadd.f32 %v2295_v21, %v668_v26  ;;  %v1784_v29 = vpop.f32.mrb[18].mxu0  ;;  %v2398_v26 = vmul.f32 %v2342_v30, %v877_v9  ;;  %2741 = vst [vmem:[#allocation11_spill] sm:$0xff] %v2427_v51 }
 0x114   : > { %v749_v33 = vmax.f32 %v677_v25, 0.0  ;;  %v680_v34 = vadd.f32 %v1784_v29, %v2295_v21  ;;  %v671_v35 = vpop.f32.mrb[19].mxu0  ;;  %v2395_v25 = vmul.f32 %v1687_v53, %v996_v8  ;;  %v1024_v8 = vld [vmem:[#allocation2 + $0xb1] sm:$0xff] }
 0x115   : > { %v747_v36 = vmax.f32 %v669_v28, 0.0  ;;  %v672_v37 = vadd.f32 %v2295_v21, %v671_v35  ;;  %v1063_v28 = vld [vmem:[#allocation2 + $0x230] sm:$0xff]  ;;  %v2407_v35 = vmul.f32 %v2391_v23, %v877_v9 }
 0x116   : > { %855 = vst.msk [vmem:[#allocation2 + $0x151] sm:$0xff] %vm521_vm0, %v749_v33  ;;  %v750_v38 = vmax.f32 %v680_v34, 0.0  ;;  %v983_v33 = vadd.f32 %v975_v7, %v950_v6  ;;  %v2404_v34 = vmul.f32 %v2358_v43, %v933_v13  ;;  %v2430_v53 = vmul.f32 %v2391_v23, %v1063_v28 }
 0x117   : > { %853 = vst.msk [vmem:[#allocation2 + $0x131] sm:$0xff] %vm521_vm0, %v747_v36  ;;  %v748_v41 = vmax.f32 %v672_v37, 0.0  ;;  %v2465_v28 = vmul.f32 %v2368_v52, %v962_v57 }
 0x118   : > { %856 = vst.msk [vmem:[#allocation2 + $0x161] sm:$0xff] %vm521_vm0, %v750_v38  ;;  %v2413_v38 = vld [vmem:[%s2718_s5 + $0x5] ss:$0 sm:$0xff]  ;;  %2742 = vst [vmem:[#allocation12_spill] sm:$0xff] %v2430_v53  ;;  %v1015_v63 = vadd.f32 %v1007_v14, %v983_v33  ;;  %v1028_v57 = vld [vmem:[#allocation2 + $0xf1] sm:$0xff] }
 0x119   : > { %854 = vst.msk [vmem:[#allocation2 + $0x141] sm:$0xff] %vm521_vm0, %v748_v41  ;;  %v1787_v44 = vpop.f32.mrb[20].mxu0  ;;  %v947_v41 = vmul.f32 %v2358_v43, %v931_v19  ;;  %v1029_v14 = vld [vmem:[#allocation2 + $0x101] sm:$0xff]  ;;  %v2477_v42 = vmul.f32 %v2413_v38, %v1026_v0 }
 0x11a   : > { %v693_v45 = vadd.f32 %v1787_v44, %v2295_v21  ;;  %v684_v46 = vpop.f32.mrb[21].mxu0  ;;  %v2423_v44 = vmul.f32 %v2391_v23, %v875_v17  ;;  %v2459_v19 = vld [vmem:[%s2718_s5 + $0x7] ss:$0 sm:$0xff]  ;;  %v1045_v18 = vmul.f32 %v2413_v38, %v1029_v14  ;;  %v1044_v14 = vmul.f32 %v2413_v38, %v1028_v57 }
 0x11b   : > { %v685_v49 = vadd.f32 %v2295_v21, %v684_v46  ;;  %v1788_v50 = vpop.f32.mrb[22].mxu0  ;;  %v1027_v33 = vld [vmem:[#allocation2 + $0xe1] sm:$0xff] }
 0x11c   : > { %v753_v54 = vmax.f32 %v693_v45, 0.0  ;;  %v696_v55 = vadd.f32 %v1788_v50, %v2295_v21  ;;  %v687_v56 = vpop.f32.mrb[23].mxu0  ;;  %2740 = vst [vmem:[#allocation10_spill] sm:$0xff] %v2423_v44  ;;  %v1126_v50 = vld [vmem:[#allocation2 + $0x211] sm:$0xff] }
 0x11d   : > { %v751_v60 = vmax.f32 %v685_v49, 0.0  ;;  %v688_v61 = vadd.f32 %v2295_v21, %v687_v56  ;;  %v1025_v49 = vld [vmem:[#allocation2 + $0xc1] sm:$0xff] }
 0x11e   : > { %859 = vst.msk [vmem:[#allocation2 + $0x191] sm:$0xff] %vm521_vm0, %v753_v54  ;;  %v754_v1 = vmax.f32 %v696_v55, 0.0  ;;  %v1023_v56 = vld [vmem:[#allocation2 + $0xa1] sm:$0xff] }
 0x11f   : > { %857 = vst.msk [vmem:[#allocation2 + $0x171] sm:$0xff] %vm521_vm0, %v751_v60  ;;  %v752_v11 = vmax.f32 %v688_v61, 0.0  ;;  %v2439_v60 = vmul.f32 %v2418_v39, %v933_v13  ;;  %v965_v13 = vld [vmem:[#allocation2 + $0x100] sm:$0xff]  ;;  %v1039_v17 = vmul.f32 %v2413_v38, %v1023_v56  ;;  %v897_v56 = vld [vmem:[#allocation2 + $0x151] sm:$0xff] }
 0x120   : > { %860 = vst.msk [vmem:[#allocation2 + $0x1a1] sm:$0xff] %vm521_vm0, %v754_v1  ;;  %v1092_v0 = vld [vmem:[#allocation2 + $0x161] sm:$0xff] }
 0x121   : > { %858 = vst.msk [vmem:[#allocation2 + $0x181] sm:$0xff] %vm521_vm0, %v752_v11  ;;  %v1791_v22 = vpop.f32.mrb[24].mxu0  ;;  %2744 = vst [vmem:[#allocation14_spill] sm:$0xff] %v2439_v60  ;;  %v948_v11 = vmul.f32 %v2358_v43, %v1126_v50 }
 0x122   : > { %v709_v29 = vadd.f32 %v1791_v22, %v2295_v21  ;;  %v700_v31 = vpop.f32.mrb[25].mxu0  ;;  %v2462_v22 = vmul.f32 %v2368_v52, %v961_v48  ;;  %v966_v48 = vld [vmem:[#allocation2 + $0x110] sm:$0xff] }
 0x123   : > { %v701_v36 = vadd.f32 %v2295_v21, %v700_v31  ;;  %v1792_v37 = vpop.f32.mrb[26].mxu0  ;;  %v963_v31 = vld [vmem:[#allocation2 + $0xe0] sm:$0xff] }
 0x124   : > { %v757_v45 = vmax.f32 %v709_v29, 0.0  ;;  %v712_v46 = vadd.f32 %v1792_v37, %v2295_v21  ;;  %v703_v47 = vpop.f32.mrb[27].mxu0  ;;  %v2468_v29 = vmul.f32 %v2413_v38, %v1025_v49  ;;  %v2474_v37 = vmul.f32 %v2368_v52, %v960_v62  ;;  %v1030_v49 = vld [vmem:[#allocation2 + $0x111] sm:$0xff] }
 0x125   : > { %v755_v54 = vmax.f32 %v701_v36, 0.0  ;;  %v704_v55 = vadd.f32 %v2295_v21, %v703_v47  ;;  %v2436_v59 = vld [vmem:[#allocation2 + $0x191] sm:$0xff]  ;;  %v2445_v21 = vmul.f32 %v2418_v39, %v1126_v50  ;;  %v981_v62 = vmul.f32 %v2368_v52, %v965_v13 }
 0x126   : > { %2743 = vst [vmem:[#allocation13_spill] sm:$0xff] %v2436_v59  ;;  %863 = vst.msk [vmem:[#allocation2 + $0x1e1] sm:$0xff] %vm521_vm0, %v757_v45  ;;  %v758_v61 = vmax.f32 %v712_v46, 0.0  ;;  %v2442_v1 = vld [vmem:[#allocation2 + $0x171] sm:$0xff]  ;;  %v917_v6 = vmul.f32 %v2347_v32, %v2436_v59 }
 0x127   : > { %2745 = vst [vmem:[#allocation15_spill] sm:$0xff] %v2442_v1  ;;  %2746 = vst [vmem:[#allocation16_spill] sm:$0xff] %v2445_v21  ;;  %v756_v7 = vmax.f32 %v704_v55, 0.0  ;;  %v915_v9 = vmul.f32 %v2347_v32, %v2442_v1  ;;  %v964_v46 = vld [vmem:[#allocation2 + $0xf0] sm:$0xff]  ;;  %v1047_v55 = vadd.f32 %v1039_v17, %v1015_v63  ;;  %v982_v63 = vmul.f32 %v2368_v52, %v966_v48 }
 0x128   : > { %861 = vst.msk [vmem:[#allocation2 + $0x1c1] sm:$0xff] %vm521_vm0, %v755_v54  ;;  %864 = vst.msk [vmem:[#allocation2 + $0x1f1] sm:$0xff] %vm521_vm0, %v758_v61  ;;  %v2470_v36 = vld [vmem:[#allocation2 + $0x181] sm:$0xff]  ;;  %v895_v50 = vld [vmem:[#allocation2 + $0x131] sm:$0xff]  ;;  %v2482_v54 = vmul.f32 %v2413_v38, %v1024_v8  ;;  %v925_v61 = vadd.f32 %v917_v6, %v2398_v26  ;;  %v980_v5 = vmul.f32 %v2368_v52, %v964_v46 }
 0x129   : > { %862 = vst.msk [vmem:[#allocation2 + $0x1d1] sm:$0xff] %vm521_vm0, %v756_v7  ;;  %v923_v45 = vadd.f32 %v915_v9, %v890_v40  ;;  %v916_v47 = vmul.f32 %v2347_v32, %v2470_v36  ;;  %v979_v40 = vmul.f32 %v2368_v52, %v963_v31  ;;  %v2488_v9 = vmul.f32 %v2413_v38, %v1027_v33 }
 0x12a   : > { %v2494_v17 = vmul.f32 %v2413_v38, %v1030_v49  ;;  %v911_v26 = vmul.f32 %v2347_v32, %v895_v50  ;;  %v2501_v31 = vmul.f32 %v2459_v19, %v897_v56  ;;  %v1105_v52 = vmul.f32 %v2459_v19, %v895_v50 }
 0x12b   : > { %v955_v7 = vadd.f32 %v947_v41, %v923_v45  ;;  %v924_v8 = vadd.f32 %v916_v47, %v891_v10  ;;  %v913_v41 = vmul.f32 %v2347_v32, %v897_v56  ;;  %v1090_v10 = vld [vmem:[#allocation2 + $0x141] sm:$0xff]  ;;  %v1108_v47 = vmul.f32 %v2459_v19, %v1092_v0 }
 0x12c   : > { %2748 = vst [vmem:[#allocation18_spill] sm:$0xff] %v2501_v31  ;;  %v957_v48 = vadd.f32 %v2404_v34, %v925_v61  ;;  %v914_v56 = vmul.f32 %v2347_v32, %v1092_v0  ;;  %v1106_v61 = vmul.f32 %v2459_v19, %v1090_v10 }
 0x12d   : > { %v873_v6 = vld [vmem:[#allocation2 + $0x1e0] sm:$0xff]  ;;  %v988_v2 = vadd.f32 %v980_v5, %v955_v7  ;;  %v956_v31 = vadd.f32 %v948_v11, %v924_v8 }
 0x12e   : > { %v2498_v13 = vld [vmem:[#allocation2 + $0x1e1] sm:$0xff]  ;;  %v888_v46 = vmul.f32 %v2342_v30, %v873_v6 }
 0x12f   : > { %2747 = vst [vmem:[#allocation17_spill] sm:$0xff] %v2498_v13  ;;  %v871_v33 = vld [vmem:[#allocation2 + $0x1c0] sm:$0xff]  ;;  %v1059_v3 = vld [vmem:[#allocation2 + $0x1f0] sm:$0xff]  ;;  %v945_v60 = vmul.f32 %v2358_v43, %v2498_v13  ;;  %v1020_v1 = vadd.f32 %v2395_v25, %v988_v2 }
 0x130   : > { %v927_v45 = vld [vmem:[#allocation2 + $0x1c1] sm:$0xff]  ;;  %v886_v49 = vmul.f32 %v2342_v30, %v871_v33  ;;  %v1072_v4 = vmul.f32 %v2391_v23, %v871_v33  ;;  %v1057_v38 = vld [vmem:[#allocation2 + $0x1d0] sm:$0xff]  ;;  %v921_v57 = vadd.f32 %v913_v41, %v888_v46  ;;  %v889_v51 = vmul.f32 %v2342_v30, %v1059_v3 }
 0x131   : > { %v1124_v50 = vld [vmem:[#allocation2 + $0x1f1] sm:$0xff]  ;;  %v943_v34 = vmul.f32 %v2358_v43, %v927_v45  ;;  %v912_v33 = vmul.f32 %v2347_v32, %v1090_v10  ;;  %v887_v0 = vmul.f32 %v2342_v30, %v1057_v38  ;;  %v990_v41 = vadd.f32 %v982_v63, %v957_v48 }
 0x132   : > { %v919_v21 = vadd.f32 %v911_v26, %v886_v49  ;;  %v1122_v59 = vld [vmem:[#allocation2 + $0x1d1] sm:$0xff]  ;;  %v953_v5 = vadd.f32 %v945_v60, %v921_v57  ;;  %v922_v7 = vadd.f32 %v914_v56, %v889_v51  ;;  %v1080_v53 = vadd.f32 %v1072_v4, %v1047_v55 }
 0x133   : > { %v946_v13 = vmul.f32 %v2358_v43, %v1124_v50  ;;  %v920_v11 = vadd.f32 %v912_v33, %v887_v0  ;;  %v944_v8 = vmul.f32 %v2358_v43, %v1122_v59  ;;  %v989_v49 = vadd.f32 %v981_v62, %v956_v31  ;;  %v2750_v31 = vld [vmem:[#allocation15_spill] sm:$0xff]  ;;  %v2751_v48 = vld [vmem:[#allocation12_spill] sm:$0xff] }
 0x134   : > { %v951_v46 = vadd.f32 %v943_v34, %v919_v21  ;;  %v986_v26 = vadd.f32 %v2465_v28, %v953_v5  ;;  %v1052_v10 = vadd.f32 %v1044_v14, %v1020_v1  ;;  %v1110_v30 = vmul.f32 %v2459_v19, %v2470_v36  ;;  %v1096_v14 = vld [vmem:[#allocation2 + $0x1a1] sm:$0xff] }
 0x135   : > { %v954_v32 = vadd.f32 %v946_v13, %v922_v7  ;;  %v952_v51 = vadd.f32 %v944_v8, %v920_v11  ;;  %v1021_v60 = vadd.f32 %v2385_v20, %v989_v49  ;;  %v1022_v2 = vadd.f32 %v2400_v27, %v990_v41  ;;  %v2756_v11 = vld [vmem:[#allocation11_spill] sm:$0xff] }
 0x136   : > { %v984_v44 = vadd.f32 %v2474_v37, %v951_v46  ;;  %v1018_v4 = vadd.f32 %v2383_v16, %v986_v26  ;;  %v1113_v43 = vadd.f32 %v1105_v52, %v1080_v53  ;;  %v1085_v28 = vadd.f32 %v2434_v58, %v1052_v10  ;;  %v2755_v0 = vld [vmem:[#allocation17_spill] sm:$0xff] }
 0x137   : > { %v987_v21 = vadd.f32 %v979_v40, %v954_v32  ;;  %v985_v37 = vadd.f32 %v2462_v22, %v952_v51  ;;  %v1075_v55 = vmul.f32 %v2391_v23, %v1059_v3  ;;  %v1053_v36 = vadd.f32 %v1045_v18, %v1021_v60 }
 0x138   : > { %v1016_v25 = vadd.f32 %v2381_v15, %v984_v44  ;;  %v1050_v1 = vadd.f32 %v2477_v42, %v1018_v4  ;;  %v1073_v16 = vmul.f32 %v2391_v23, %v1057_v38  ;;  %v1137_v20 = vmul.f32 %v2418_v39, %v927_v45  ;;  %v2752_v38 = vld [vmem:[#allocation13_spill] sm:$0xff] }
 0x139   : > { %v1019_v27 = vadd.f32 %v2393_v24, %v987_v21  ;;  %v1017_v15 = vadd.f32 %v2378_v12, %v985_v37  ;;  %v1074_v44 = vmul.f32 %v2391_v23, %v873_v6  ;;  %v1054_v58 = vadd.f32 %v2494_v17, %v1022_v2  ;;  %v2749_v17 = vld [vmem:[#allocation10_spill] sm:$0xff] }
 0x13a   : > { %v1048_v62 = vadd.f32 %v2482_v54, %v1016_v25  ;;  %v1083_v53 = vadd.f32 %v1075_v55, %v1050_v1  ;;  %v1145_v42 = vadd.f32 %v1137_v20, %v1113_v43  ;;  %v1118_v18 = vadd.f32 %v1110_v30, %v1085_v28  ;;  %v1696_v54 = vld [vmem:[%s2719_s6] ss:$0 sm:$0xff] }
 0x13b   : > { %v1051_v3 = vadd.f32 %v2488_v9, %v1019_v27  ;;  %v1049_v40 = vadd.f32 %v2468_v29, %v1017_v15  ;;  %v1140_v24 = vmul.f32 %v2418_v39, %v1124_v50  ;;  %v1086_v12 = vadd.f32 %v2407_v35, %v1053_v36  ;;  %v2753_v35 = vld [vmem:[#allocation16_spill] sm:$0xff]  ;;  %v2757_v25 = vld [vmem:[#allocation14_spill] sm:$0xff] }
 0x13c   : > { %v1081_v22 = vadd.f32 %v1073_v16, %v1048_v62  ;;  %v1116_v63 = vadd.f32 %v1108_v47, %v1083_v53  ;;  %v1138_v6 = vmul.f32 %v2418_v39, %v1122_v59  ;;  %v1109_v9 = vmul.f32 %v2459_v19, %v2750_v31  ;;  %v2754_v59 = vld [vmem:[#allocation18_spill] sm:$0xff] }
 0x13d   : > { %v1084_v13 = vadd.f32 %v2749_v17, %v1051_v3  ;;  %v1082_v45 = vadd.f32 %v1074_v44, %v1049_v40  ;;  %v1087_v56 = vadd.f32 %v2751_v48, %v1054_v58  ;;  %v1111_v29 = vmul.f32 %v2459_v19, %v2752_v38  ;;  %v2758_v44 = vld [vmem:[#allocation6_spill] sm:$0xff]  ;;  %v1907_v58 = vld [vmem:[%s2716_s3 + $0x8] sm:$0xff]   ;;  %v2761_v3 = vld [vmem:[#allocation8_spill] sm:$0xff] }
 0x13e   : > { %v1114_v23 = vadd.f32 %v1106_v61, %v1081_v22  ;;  %v1148_v52 = vadd.f32 %v1140_v24, %v1116_v63  ;;  %v1160_v57 = vadd.f32 %v1696_v54, %v1145_v42  ;;  %v1150_v34 = vadd.f32 %v2753_v35, %v1118_v18  ;;  %v1128_v61 = vld [vmem:[#allocation2 + $0x231] sm:$0xff]  ;;  %v1906_v53 = vld [vmem:[%s2716_s3] sm:$0xff]   ;;  %v2760_v42 = vld [vmem:[#allocation7_spill] sm:$0xff] }
 0x13f   : > { %v1117_v50 = vadd.f32 %v1109_v9, %v1084_v13  ;;  %v1115_v33 = vadd.f32 %v2754_v59, %v1082_v45  ;;  %v1139_v5 = vmul.f32 %v2418_v39, %v2755_v0  ;;  %v1112_v7 = vmul.f32 %v2459_v19, %v1096_v14  ;;  %1809 = vmatprep.subr.bf16.mxu1 %v1906_v53  ;;  %v1908_v18 = vld [vmem:[%s2722_s9] sm:$0xff]   ;;  %v2762_v40 = vld [vmem:[#allocation9_spill] sm:$0xff]  ;;  %v1910_v63 = vld [vmem:[%s2722_s9 + $0x10] sm:$0xff]  }
 0x140   : > { %v1146_v47 = vadd.f32 %v1138_v6, %v1114_v23  ;;  %v1119_v41 = vadd.f32 %v1111_v29, %v1086_v12  ;;  %v1163_v49 = vadd.f32 %v1696_v54, %v1148_v52  ;;  %v1144_v10 = vmul.f32 %v2418_v39, %v1128_v61  ;;  %v1911_v24 = vld [vmem:[%s2722_s9 + $0x18] sm:$0xff]   ;;  %v1697_v12 = vld [vmem:[%s2721_s8] ss:$0 sm:$0xff] }
 0x141   : > { %v1149_v8 = vadd.f32 %v2756_v11, %v1117_v50  ;;  %v1147_v26 = vadd.f32 %v1139_v5, %v1115_v33  ;;  %v1120_v32 = vadd.f32 %v1112_v7, %v1087_v56  ;;  %v1168_v30 = vmax.f32 %v1160_v57, 0.0 }
 0x142   : > { %v1161_v46 = vadd.f32 %v1696_v54, %v1146_v47  ;;  %v1165_v60 = vadd.f32 %v1696_v54, %v1150_v34  ;;  %v1151_v43 = vadd.f32 %v2757_v25, %v1119_v41  ;;  %v1171_v19 = vmax.f32 %v1163_v49, 0.0  ;;  %v1470_v25 = vld [vmem:[%s2723_s10] sm:$0x3] }
 0x143   : > { %v1164_v4 = vadd.f32 %v1696_v54, %v1149_v8  ;;  %v1162_v2 = vadd.f32 %v1696_v54, %v1147_v26  ;;  %v1152_v1 = vadd.f32 %v1144_v10, %v1120_v32  ;;  %v2759_v22 = vmov 0.0  }
 0x144   : > { %v1169_v51 = vmax.f32 %v1161_v46, 0.0  ;;  %v1173_v55 = vmax.f32 %v1165_v60, 0.0  ;;  %v1166_v62 = vadd.f32 %v1696_v54, %v1151_v43 }
 0x145   : > { %v1172_v28 = vmax.f32 %v1164_v4, 0.0  ;;  %v1170_v37 = vmax.f32 %v1162_v2, 0.0  ;;  %v1167_v39 = vadd.f32 %v1696_v54, %v1152_v1  ;;  %v1909_v54 = vld [vmem:[%s2722_s9 + $0x8] sm:$0xff]  }
 0x146   : > { %v1176_v21 = vpack.c.bf16 %v1169_v51, %v1168_v30  ;;  %v1174_v20 = vmax.f32 %v1166_v62, 0.0 }
 0x147   : > { %v1177_v36 = vpack.c.bf16 %v1171_v19, %v1170_v37  ;;  %v1178_v16 = vpack.c.bf16 %v1173_v55, %v1172_v28  ;;  %v1175_v27 = vmax.f32 %v1167_v39, 0.0  ;;  %v1477_v28 = vsel %vm1475_vm4, %v1470_v25, 0 }
 0x148   : > { %1801 = vmatprep.mubr.msk.bf16.mxu1 %vm521_vm0, %v1176_v21 }
 0x149   : > { %1802 = vmatmul.mubr.msk.bf16.vlgmr.msra.gmra.mrb[4].mxu1 %vm521_vm0, %v1177_v36  ;;  %v1179_v15 = vpack.c.bf16 %v1175_v27, %v1174_v20 }
 0x14a   : > { %1805 = vmatprep.mubr.msk.bf16.mxu1 %vm521_vm0, %v1178_v16  ;;  %1810 = vmatpush3.bf16.msra.mxu1 %v1906_v53 }
 0x14b   : > { %1811 = vmatprep.subr.bf16.mxu1 %v1907_v58 }
 0x14e   : > { %1812 = vmatpush3.bf16.msra.mxu1 %v1907_v58 }
 0x14f   : > { %1821 = vmatprep.subr.bf16.mxu1 %v2759_v22 }
 0x151   : > { %1806 = vmatmul.mubr.msk.bf16.gmra.mrb[8].mxu1 %vm521_vm0, %v1179_v15 }
 0x152   : > { %1813 = vmatprep.mubr.msk.bf16.mxu1 %vm521_vm0, %v2758_v44 }
 0x159   : > { %1814 = vmatmul.mubr.msk.bf16.vlgmr.msra.gmra.mrb[12].mxu1 %vm521_vm0, %v2760_v42 }
 0x15a   : > { %1817 = vmatprep.mubr.msk.bf16.mxu1 %vm521_vm0, %v2761_v3  ;;  %1822 = vmatpush3.bf16.msra.mxu1 %v1908_v18 }
 0x15b   : > { %1823 = vmatprep.subr.bf16.mxu1 %v2759_v22 }
 0x15e   : > { %1824 = vmatpush3.bf16.msra.mxu1 %v1909_v54 }
 0x15f   : > { %1825 = vmatprep.subr.bf16.mxu1 %v2759_v22 }
 0x161   : > { %1818 = vmatmul.mubr.msk.bf16.gmra.mrb[16].mxu1 %vm521_vm0, %v2762_v40 }
 0x162   : > { %1826 = vmatpush3.bf16.msra.mxu1 %v1910_v63  ;;  %1829 = vmatprep.mubr.msk.bf16.mxu1 %vm1981_vm2, %v2759_v22 }
 0x163   : > { %1827 = vmatprep.subr.bf16.mxu1 %v2759_v22 }
 0x166   : > { %1828 = vmatpush3.bf16.msra.mxu1 %v1911_v24 }
 0x167   : > { %1833 = vmatprep.subr.bf16.mxu1 %v2759_v22 }
 0x21c   : > { %v1803_v23 = vpop.f32.mrb[4].mxu1 }
 0x21d   : > { %v1249_v6 = vpop.f32.mrb[5].mxu1  ;;  %v2604_v9 = vadd.f32 %v1803_v23, %v1697_v12 }
 0x21e   : > { %v2602_v17 = vadd.f32 %v1697_v12, %v1249_v6  ;;  %v1804_v13 = vpop.f32.mrb[6].mxu1  ;;  %v1704_v6 = vld [vmem:[%s2717_s4] ss:$0 sm:$0xff] }
 0x21f   : > { %v1252_v31 = vpop.f32.mrb[7].mxu1  ;;  %v2610_v52 = vadd.f32 %v1804_v13, %v1697_v12  ;;  %v1372_v38 = vsel %vm1368_vm3, %v2604_v9, 0.0 }
 0x220   : > { %v2606_v14 = vadd.f32 %v1697_v12, %v1252_v31  ;;  %v1369_v45 = vsel %vm1368_vm3, %v2602_v17, 0.0 }
 0x221   : > { %v1374_v50 = vsel %vm1368_vm3, %v2610_v52, 0.0 }
 0x222   : > { %v1370_v48 = vsel %vm1368_vm3, %v2606_v14, 0.0 }
 0x223   : > { %v1371_v56 = vadd.f32 %v1370_v48, %v1369_v45 }
 0x224   : > { %v1807_v29 = vpop.f32.mrb[8].mxu1 }
 0x225   : > { %v1373_v47 = vadd.f32 %v1372_v38, %v1371_v56  ;;  %v1265_v57 = vpop.f32.mrb[9].mxu1  ;;  %v2620_v33 = vadd.f32 %v1807_v29, %v1697_v12 }
 0x226   : > { %v2618_v35 = vadd.f32 %v1697_v12, %v1265_v57  ;;  %v1808_v34 = vpop.f32.mrb[10].mxu1 }
 0x227   : > { %v1375_v61 = vadd.f32 %v1374_v50, %v1373_v47  ;;  %v1268_v59 = vpop.f32.mrb[11].mxu1  ;;  %v2626_v41 = vadd.f32 %v1808_v34, %v1697_v12  ;;  %v1380_v8 = vsel %vm1368_vm3, %v2620_v33, 0.0 }
 0x228   : > { %v1376_v0 = vsel %vm1368_vm3, %v2618_v35, 0.0  ;;  %v2624_v5 = vadd.f32 %v1697_v12, %v1268_v59  ;;  %v1525_v12 = vlaneseq }
 0x229   : > { %v1377_v7 = vadd.f32 %v1376_v0, %v1375_v61  ;;  %v1382_v49 = vsel %vm1368_vm3, %v2626_v41, 0.0 }
 0x22a   : > { %v1378_v46 = vsel %vm1368_vm3, %v2624_v5, 0.0  ;;  %v1526_v23 = vshrl.u32 %v1525_v12, 7 }
 0x22b   : > { %v1379_v11 = vadd.f32 %v1378_v46, %v1377_v7 }
 0x22c   : > { %v1815_v37 = vpop.f32.mrb[12].mxu1  ;;  %v1527_v13 = vsub.s32 0, %v1526_v23 }
 0x22d   : > { %v1381_v26 = vadd.f32 %v1380_v8, %v1379_v11  ;;  %v1337_v19 = vpop.f32.mrb[13].mxu1  ;;  %v1346_v45 = vadd.f32 %v1815_v37, %v1704_v6 }
 0x22e   : > { %v1816_v1 = vpop.f32.mrb[14].mxu1  ;;  %v1338_v48 = vadd.f32 %v1704_v6, %v1337_v19 }
 0x22f   : > { %v1383_v32 = vadd.f32 %v1382_v49, %v1381_v26  ;;  %v1340_v55 = vpop.f32.mrb[15].mxu1  ;;  %v1349_v56 = vadd.f32 %v1816_v1, %v1704_v6 }
 0x230   : > { %v1341_v38 = vadd.f32 %v1704_v6, %v1340_v55 }
 0x231   : > { %v1384_v10 = vrot.slane %v1383_v32, 4 }
 0x233   : > { %v1385_v30 = vadd.f32 %v1384_v10, %v1383_v32 }
 0x234   : > { %v1819_v36 = vpop.f32.mrb[16].mxu1 }
 0x235   : > { %v1386_v51 = vrot.slane %v1385_v30, 2  ;;  %v1353_v62 = vpop.f32.mrb[17].mxu1  ;;  %v1362_v47 = vadd.f32 %v1819_v36, %v1704_v6 }
 0x236   : > { %v1820_v16 = vpop.f32.mrb[18].mxu1  ;;  %v1354_v57 = vadd.f32 %v1704_v6, %v1353_v62 }
 0x237   : > { %v1387_v4 = vadd.f32 %v1386_v51, %v1385_v30  ;;  %v1356_v39 = vpop.f32.mrb[19].mxu1  ;;  %v1365_v50 = vadd.f32 %v1820_v16, %v1704_v6 }
 0x238   : > { %v1357_v34 = vadd.f32 %v1704_v6, %v1356_v39 }
 0x239   : > { %v1388_v60 = vrot.slane %v1387_v4, 1 }
 0x23b   : > { %v1389_v2 = vadd.f32 %v1388_v60, %v1387_v4 }
 0x23d   : > { %v1391_v43 = vmul.f32 0.015625, %v1389_v2 }
 0x23f   : > { %v1392_v21 = vpack.c.bf16 %v1391_v43, %v1391_v43 }
 0x241   : > { %1830 = vmatmul.mubr.msk.bf16.vlgmr.msra.gmra.mrb[20].mxu1 %vm1368_vm3, %v1392_v21 }
 0x242   : > { %1834 = vmatpush3.bf16.msra.mxu1 %v1477_v28  ;;  %1835 = vmatprep.mubr.msk.bf16.mxu1 %vm1981_vm2, %v2759_v22 }
 0x314   : > { %v1462_v20 = vpop.f32.mrb[20].mxu1 }
 0x315   : > { %v1468_v27 = vmax.f32 %v1462_v20, 0.0  ;;  %v1831_v15 = vpop.f32.mrb[21].mxu1 }
 0x316   : > { %v1465_v44 = vpop.f32.mrb[22].mxu1 }
 0x317   : > { %v1469_v53 = vpack.c.bf16 %v1468_v27, %v1468_v27  ;;  %v1832_v58 = vpop.f32.mrb[23].mxu1 }
 0x319   : > { %1836 = vmatmul.mubr.msk.bf16.vlgmr.msra.gmra.mrb[24].mxu1 %vm1471_vm5, %v1469_v53 }
 0x3ec   : > { %v1513_v42 = vpop.f32.mrb[24].mxu1 }
 0x3ed   : > { %v1519_v22 = vsub.f32 0.0, %v1513_v42  ;;  %v1837_v3 = vpop.f32.mrb[25].mxu1 }
 0x3ee   : > { %v1516_v18 = vpop.f32.mrb[26].mxu1 }
 0x3ef   : > { %v1520_v54 = vmul.f32 1.442695, %v1519_v22  ;;  %v1838_v40 = vpop.f32.mrb[27].mxu1 }
 0x3f1   : > { %1912 = vpow2.f32 %v1520_v54 }
 0x3fb   : > { %v1913_v63 = vpop.eup %1912 }
 0x3fc   : > { %v1522_v24 = vadd.f32 1.0, %v1913_v63 }
 0x3fe   : > { %1914 = vrcp.f32 %v1522_v24 }
 0x408   : > { %v1915_v31 = vpop.eup %1914 }
 0x409   : > { %v1528_v29 = vrot.slane %v1915_v31, %v1527_v13 }
 0x40b   : > { %v1529_v61 = vmul.f32 %v1528_v29, %v2602_v17  ;;  %v1530_v59 = vmul.f32 %v1528_v29, %v2606_v14  ;;  %v1531_v0 = vmul.f32 %v1528_v29, %v2604_v9  ;;  %v1532_v7 = vmul.f32 %v1528_v29, %v2610_v52 }
 0x40c   : > { %v1533_v46 = vmul.f32 %v1528_v29, %v2618_v35  ;;  %v1534_v11 = vmul.f32 %v1528_v29, %v2624_v5  ;;  %v1535_v8 = vmul.f32 %v1528_v29, %v2620_v33  ;;  %v1536_v26 = vmul.f32 %v1528_v29, %v2626_v41 }
 0x40d   : > { %v1537_v49 = vadd.f32 %v1529_v61, %v1338_v48  ;;  %v1538_v32 = vadd.f32 %v1530_v59, %v1341_v38  ;;  %v1539_v17 = vadd.f32 %v1531_v0, %v1346_v45  ;;  %v1540_v10 = vadd.f32 %v1532_v7, %v1349_v56 }
 0x40e   : > { %v1541_v14 = vadd.f32 %v1533_v46, %v1354_v57  ;;  %v1542_v30 = vadd.f32 %v1534_v11, %v1357_v34  ;;  %v1543_v9 = vadd.f32 %v1535_v8, %v1362_v47  ;;  %v1544_v51 = vadd.f32 %v1536_v26, %v1365_v50 }
 0x40f   : > { %v1545_v52 = vmax.f32 %v1537_v49, 0.0  ;;  %v1546_v4 = vmax.f32 %v1538_v32, 0.0  ;;  %v1547_v35 = vmax.f32 %v1539_v17, 0.0  ;;  %v1548_v5 = vmax.f32 %v1540_v10, 0.0 }
 0x410   : > { %v1549_v33 = vmax.f32 %v1541_v14, 0.0  ;;  %v1550_v41 = vmax.f32 %v1542_v30, 0.0  ;;  %v1551_v60 = vmax.f32 %v1543_v9, 0.0  ;;  %v1552_v2 = vmax.f32 %v1544_v51, 0.0 }
 0x411   : > { %1553 = vst.msk [vmem:[%s379_s16] sm:$0xff] %vm1368_vm3, %v1545_v52  ;;  %1554 = vst.msk [vmem:[%s379_s16 + $0x8] sm:$0xff] %vm1368_vm3, %v1546_v4 }
 0x412   : > { %1555 = vst.msk [vmem:[%s379_s16 + $0x10] sm:$0xff] %vm1368_vm3, %v1547_v35  ;;  %1556 = vst.msk [vmem:[%s379_s16 + $0x18] sm:$0xff] %vm1368_vm3, %v1548_v5 }
 0x413   : > { %1557 = vst.msk [vmem:[%s379_s16 + $0x20] sm:$0xff] %vm1368_vm3, %v1549_v33  ;;  %1558 = vst.msk [vmem:[%s379_s16 + $0x28] sm:$0xff] %vm1368_vm3, %v1550_v41 }
 0x414   : > { %1559 = vst.msk [vmem:[%s379_s16 + $0x30] sm:$0xff] %vm1368_vm3, %v1551_v60  ;;  %1560 = vst.msk [vmem:[%s379_s16 + $0x38] sm:$0xff] %vm1368_vm3, %v1552_v2 }
 0x415   : > { %1929 = shalt.err (!%p1926_p3)
}
 0x416   : > { %s1930_s30 = scalar_lea.hbm %s2658_s29, 1024  ;;  %s1934_s25 = scalar_lea.hbm %s2724_s11, 2048 }
 0x417   : > { %p1931_p4 = scmp.ne.s32.totalorder %s2658_s29, %s1930_s30  ;;  %p1935_p9 = scmp.lt.u32.totalorder %s2658_s29, %s2724_s11 }
 0x418   : > { %p1936_p10 = scmp.lt.u32.totalorder %s1934_s25, %s1930_s30  ;;  %p1938_p12 = scmp.lt.u32.totalorder %s1930_s30, %s2658_s29 }
 0x419   : > { %p1932_p7 = pnand %p1931_p4, %p2083_p5 }
 0x41a   : > { %p1937_p11 = por %p1936_p10, %p1935_p9 }
 0x41b   : > { %p1933_p8 = pneg %p1932_p7 }
 0x41c   : > { %p1939_p13 = por %p1938_p12, %p1937_p11 }
 0x41e   : > { %p1940_p0 = pnand %p1939_p13, %p1933_p8 }
 0x420   : > { %1943 = shalt.err (!%p1940_p0)
}
 0x421   : > { %s1983_s12 = smov 128   ;;  %s1984_s15 = smov 8  }
 0x422   : > { %1843 = dma.vmem_to_hbm [thread:$0]  (%p2083_p5), %s2660_s22, 1024, %s2658_s29, %s2672_s21, %s1983_s12, %s1983_s12, %s1984_s15  }
 0x423 PF: > { %p1849_p1 = scmp.ge.s32.totalorder %s1978_s20, 2  ;;  %s1590_s16 = sand.u32 1, %s1966_s17  }
 0x424   : > { %s1591_s30 = scalar_lea.sflag [#allocation4], %s1590_s16 }
 0x425   : > { %p1846_p2 = pnand %p1849_p1, %p2087_p6 }
 0x427   : > { %1961 = dma.done.wait (!%p1846_p2), %s1591_s30, 1024  }
 0x428   : > { %1963 = vsyncadd (!%p1846_p2), %s1591_s30, 4294966272  ;;  %p21_p3 = scmp.ge.s32.totalorder %s2070_s23, 4   ;;  %s2763_s17 = smov %s1970_s18 }
 0x429   : > { %s2764_s18 = smov %s1974_s19  ;;  %s2765_s19 = smov %s2081_s26 }
 0x42a   : > { %s2766_s20 = smov %s2070_s23  ;;  %23 = sbr.rel (!%p21_p3) target bundleno = 3 (0x3), region = 113 }
 0x431   :  { %1596 = vsyncpa [#allocation4], 1 }
 0x432   :  { %1598 = vsyncpa [#allocation4 + $0x1], 1 }

</bundles_post_ra>
